<compile_context>
chip_gen: v7x
topology: tpu7x:2x2x1
jax: 0.10.0
libtpu: 0.0.40
codegen_flags: <defaults>
</compile_context>

<pallas_src>
import functools

import jax
import jax.numpy as jnp
import numpy as np
from jax.experimental import pallas as pl
from jax.experimental.pallas import tpu as pltpu


# ----------------------------- Pallas kernel -------------------------------


def _layernorm(x, gamma, beta, eps=1e-6):
    mean = jnp.mean(x, axis=-1, keepdims=True)
    var = jnp.mean((x - mean) ** 2, axis=-1, keepdims=True)
    return (x - mean) * jax.lax.rsqrt(var + eps) * gamma + beta


def fused_encoder_kernel(
    # inputs
    x_ref, x1_ref, mask_ref,
    wqk_ref, wv_ref, whh_ref, bh_ref, wh1h_ref, bh1_ref,
    lt_w1_ref, lt_b1_ref, lt_w2_ref, lt_b2_ref,
    lt1_w1_ref, lt1_b1_ref, lt1_w2_ref, lt1_b2_ref,
    g1_ref, be1_ref, g2_ref, be2_ref,
    # outputs
    out_x1_ref, out_a_ref,
    # scratch (per-batch-element activation carry, resident across layers)
    act0_ref, act1_ref,
    *, num_heads, compute_dtype,
):
    layer = pl.program_id(1)
    num_layers = pl.num_programs(1)

    # Load this batch element's activations into VMEM scratch at layer 0; all
    # later layers read/write the scratch only (no HBM round trips).
    @pl.when(layer == 0)
    def _():
        act0_ref[...] = x_ref[0]
        act1_ref[...] = x1_ref[0]

    x = act0_ref[...]          # (S, D) stream 0
    x1 = act1_ref[...]         # (S, D) stream 1
    mask = mask_ref[...]       # (S, S) additive mask (grid-invariant)
    S, D = x.shape
    dk = D // num_heads
    scale = 1.0 / float(np.sqrt(dk))

    cd = compute_dtype

    def mm(a, b):
        return jnp.dot(a.astype(cd), b.astype(cd),
                       preferred_element_type=jnp.float32)

    # Fused Q/K projection (single (D, 2D) matmul) and the V projection.
    qk = mm(x, wqk_ref[0])     # (S, 2D): [:, :D] = Q, [:, D:] = K
    v = mm(x1, wv_ref[0])      # (S, D)

    # Per-head scaled-dot-product attention.  The output projections W_h / W_h1
    # are folded into the head loop via per-head (dk, D) weight slabs, so no
    # lane-dim concatenation of head outputs is needed.
    a_parts = []
    attn_acc = None
    attn1_acc = None
    for h in range(num_heads):
        q_h = qk[:, h * dk:(h + 1) * dk] * scale   # Q scaled (used for scores AND H = A @ Q)
        k_h = qk[:, D + h * dk:D + (h + 1) * dk]
        v_h = v[:, h * dk:(h + 1) * dk]

        s_h = mm(q_h, k_h.T) + mask
        s_h = s_h - jnp.max(s_h, axis=-1, keepdims=True)
        e = jnp.exp(s_h)
        # NOTE: pl.reciprocal(denom, approx=True) would route this divide to the
        # EUP (useful on v5e); kept exact here to match the f32 reference tightly.
        a_h = e / jnp.sum(e, axis=-1, keepdims=True)
        a_parts.append(a_h)

        h0 = mm(a_h, q_h)                 # H  = A @ Q_scaled   (S, dk)
        h1 = mm(a_h, v_h)                 # H1 = A @ V          (S, dk)
        p0 = mm(h0, whh_ref[0, h])        # per-head slab of W_h  -> (S, D)
        p1 = mm(h1, wh1h_ref[0, h])       # per-head slab of W_h1 -> (S, D)
        attn_acc = p0 if attn_acc is None else attn_acc + p0
        attn1_acc = p1 if attn1_acc is None else attn1_acc + p1

    attn_out = attn_acc + bh_ref[0]
    attn_out1 = attn1_acc + bh1_ref[0]

    g1, be1 = g1_ref[0], be1_ref[0]
    g2, be2 = g2_ref[0], be2_ref[0]

    # stream 0: residual + LN, two-layer ReLU MLP, residual + LN
    oa = _layernorm(x + attn_out, g1, be1)
    hmid = jnp.maximum(mm(oa, lt_w1_ref[0]) + lt_b1_ref[0], 0.0)
    ob = mm(hmid, lt_w2_ref[0]) + lt_b2_ref[0]
    oc = _layernorm(oa + ob, g2, be2)

    # stream 1
    oa1 = _layernorm(x1 + attn_out1, g1, be1)
    hmid1 = jnp.maximum(mm(oa1, lt1_w1_ref[0]) + lt1_b1_ref[0], 0.0)
    ob1 = mm(hmid1, lt1_w2_ref[0]) + lt1_b2_ref[0]
    oc1 = _layernorm(oa1 + ob1, g2, be2)

    # Carry the new activations in VMEM for the next layer.
    act0_ref[...] = oc
    act1_ref[...] = oc1

    # Encoder.forward only returns the last layer's x1 and A: materialize them
    # (single stores) at the final layer only.
    @pl.when(layer == num_layers - 1)
    def _():
        out_x1_ref[0] = oc1
        out_a_ref[0] = jnp.stack(a_parts, axis=0)


# ------------------------------ wrapper -------------------------------------


def encoder_pallas(x, x1, mask, layer_params, num_heads,
                   compute_dtype=jnp.float32):
    """Runs the whole Encoder (all layers) in one fused pallas_call.

    Grid = (batch, num_layers): batch is 'parallel' (v7x megacore), the layer
    axis is the innermost 'arbitrary' axis; inter-layer activations stay in
    VMEM scratch.  Per-layer weights are stacked along a leading layer axis and
    streamed via layer-indexed BlockSpecs.
    """
    B, S, D = x.shape
    L = len(layer_params)
    Hd = layer_params[0]["lt_w1"].shape[1]
    dk = D // num_heads

    def stack(fn):
        return jnp.stack([fn(p) for p in layer_params], axis=0)

    stacked = [
        stack(lambda p: jnp.concatenate([p["wq"], p["wk"]], axis=1)),   # wqk  (L, D, 2D)
        stack(lambda p: p["wv"]),                                       # wv   (L, D, D)
        stack(lambda p: p["wh"].reshape(num_heads, dk, D)),             # whh  (L, H, dk, D)
        stack(lambda p: p["bh"].reshape(1, D)),                         # bh   (L, 1, D)
        stack(lambda p: p["wh1"].reshape(num_heads, dk, D)),            # wh1h (L, H, dk, D)
        stack(lambda p: p["bh1"].reshape(1, D)),                        # bh1  (L, 1, D)
        stack(lambda p: p["lt_w1"]),                                    # (L, D, Hd)
        stack(lambda p: p["lt_b1"].reshape(1, Hd)),
        stack(lambda p: p["lt_w2"]),                                    # (L, Hd, D)
        stack(lambda p: p["lt_b2"].reshape(1, D)),
        stack(lambda p: p["lt1_w1"]),
        stack(lambda p: p["lt1_b1"].reshape(1, Hd)),
        stack(lambda p: p["lt1_w2"]),
        stack(lambda p: p["lt1_b2"].reshape(1, D)),
        stack(lambda p: p["g1"].reshape(1, D)),
        stack(lambda p: p["be1"].reshape(1, D)),
        stack(lambda p: p["g2"].reshape(1, D)),
        stack(lambda p: p["be2"].reshape(1, D)),
    ]

    def layer_spec(shape):
        nd = len(shape)
        return pl.BlockSpec((1,) + tuple(shape[1:]),
                            lambda b, l: (l,) + (0,) * (nd - 1))

    in_specs = [
        pl.BlockSpec((1, S, D), lambda b, l: (b, 0, 0)),    # x   (read at layer 0)
        pl.BlockSpec((1, S, D), lambda b, l: (b, 0, 0)),    # x1  (read at layer 0)
        pl.BlockSpec((S, S), lambda b, l: (0, 0)),          # mask (grid-invariant)
    ] + [layer_spec(a.shape) for a in stacked]

    out_shapes = (
        jax.ShapeDtypeStruct((B, S, D), jnp.float32),             # final x1
        jax.ShapeDtypeStruct((B, num_heads, S, S), jnp.float32),  # final A
    )
    out_specs = (
        pl.BlockSpec((1, S, D), lambda b, l: (b, 0, 0)),
        pl.BlockSpec((1, num_heads, S, S), lambda b, l: (b, 0, 0, 0)),
    )

    kernel = functools.partial(fused_encoder_kernel, num_heads=num_heads,
                               compute_dtype=compute_dtype)
    out_x1, out_a = pl.pallas_call(
        kernel,
        out_shape=out_shapes,
        grid=(B, L),
        in_specs=in_specs,
        out_specs=out_specs,
        scratch_shapes=[pltpu.VMEM((S, D), jnp.float32),
                        pltpu.VMEM((S, D), jnp.float32)],
        compiler_params=pltpu.CompilerParams(
            dimension_semantics=("parallel", "arbitrary")),
    )(x, x1, mask, *stacked)
    return out_x1, out_a


# --------------------------- pure-JAX reference ------------------------------


def encoder_layer_ref(x, x1, mask, p, num_heads):
    B, S, D = x.shape
    dk = D // num_heads

    def split(t):
        return t.reshape(B, S, num_heads, dk).transpose(0, 2, 1, 3)

    def merge(t):
        return t.transpose(0, 2, 1, 3).reshape(B, S, D)

    Q = split(x @ p["wq"])
    K = split(x @ p["wk"])
    V = split(x1 @ p["wv"])
    Qs = Q / np.sqrt(dk)
    scores = Qs @ K.transpose(0, 1, 3, 2) + mask[None, None]
    A = jax.nn.softmax(scores, axis=-1)
    H = merge(A @ Qs) @ p["wh"] + p["bh"]
    H1 = merge(A @ V) @ p["wh1"] + p["bh1"]

    def ln(t, g, b):
        m = jnp.mean(t, axis=-1, keepdims=True)
        v = jnp.mean((t - m) ** 2, axis=-1, keepdims=True)
        return (t - m) / jnp.sqrt(v + 1e-6) * g + b

    oa = ln(x + H, p["g1"], p["be1"])
    ob = jnp.maximum(oa @ p["lt_w1"] + p["lt_b1"], 0.0) @ p["lt_w2"] + p["lt_b2"]
    oc = ln(oa + ob, p["g2"], p["be2"])
    oa1 = ln(x1 + H1, p["g1"], p["be1"])
    ob1 = jnp.maximum(oa1 @ p["lt1_w1"] + p["lt1_b1"], 0.0) @ p["lt1_w2"] + p["lt1_b2"]
    oc1 = ln(oa1 + ob1, p["g2"], p["be2"])
    return oc, oc1, A


def encoder_ref(x, x1, mask, layer_params, num_heads):
    a = None
    for p in layer_params:
        x, x1, a = encoder_layer_ref(x, x1, mask, p, num_heads)
    return x1, a


# ------------------------------- params --------------------------------------


def init_layer_params(key, feature_dim, hidden_dim):
    keys = jax.random.split(key, 10)
    sc = 0.1
    n = jax.random.normal
    return {
        "wq": sc * n(keys[0], (feature_dim, feature_dim), jnp.float32),
        "wk": sc * n(keys[1], (feature_dim, feature_dim), jnp.float32),
        "wv": sc * n(keys[2], (feature_dim, feature_dim), jnp.float32),
        "wh": sc * n(keys[3], (feature_dim, feature_dim), jnp.float32),
        "bh": sc * n(keys[4], (feature_dim,), jnp.float32),
        "wh1": sc * n(keys[5], (feature_dim, feature_dim), jnp.float32),
        "bh1": sc * n(keys[6], (feature_dim,), jnp.float32),
        "lt_w1": sc * n(keys[7], (feature_dim, hidden_dim), jnp.float32),
        "lt_b1": jnp.zeros((hidden_dim,), jnp.float32),
        "lt_w2": sc * n(keys[8], (hidden_dim, feature_dim), jnp.float32),
        "lt_b2": jnp.zeros((feature_dim,), jnp.float32),
        "lt1_w1": sc * n(keys[9], (feature_dim, hidden_dim), jnp.float32),
        "lt1_b1": jnp.zeros((hidden_dim,), jnp.float32),
        "lt1_w2": sc * n(jax.random.fold_in(key, 99), (hidden_dim, feature_dim), jnp.float32),
        "lt1_b2": jnp.zeros((feature_dim,), jnp.float32),
        "g1": jnp.ones((feature_dim,), jnp.float32),
        "be1": jnp.zeros((feature_dim,), jnp.float32),
        "g2": jnp.ones((feature_dim,), jnp.float32),
        "be2": jnp.zeros((feature_dim,), jnp.float32),
    }


# --------------------------------- main ---------------------------------------


if __name__ == "__main__":
    num_layers = 2
    batch, seq, feature_dim, num_heads, hidden_dim = 2, 8, 32, 4, 64

    root = jax.random.PRNGKey(0)
    kx, kx1, kmask, kparams = jax.random.split(root, 4)

    x = jax.random.normal(kx, (batch, seq, feature_dim), jnp.float32)
    x1 = jax.random.normal(kx1, (batch, seq, feature_dim), jnp.float32)
    # additive mask (causal) to exercise the mask path
    attn_mask = jnp.where(jnp.tril(jnp.ones((seq, seq), bool)), 0.0, -1e9).astype(jnp.float32)

    layer_params = [
        init_layer_params(jax.random.fold_in(kparams, i), feature_dim, hidden_dim)
        for i in range(num_layers)
    ]

    # compute_dtype=jnp.bfloat16 enables the native MXU path on v6e/v7x at
    # production sizes; f32 here keeps the tight reference tolerance.
    out_x1, out_a = encoder_pallas(x, x1, attn_mask, layer_params, num_heads,
                                   compute_dtype=jnp.float32)
    out_x1 = jax.block_until_ready(out_x1)
    out_a = jax.block_until_ready(out_a)

    ref_x1, ref_a = encoder_ref(x, x1, attn_mask, layer_params, num_heads)
    np.testing.assert_allclose(np.asarray(out_x1), np.asarray(ref_x1), rtol=1e-3, atol=1e-4)
    np.testing.assert_allclose(np.asarray(out_a), np.asarray(ref_a), rtol=1e-3, atol=1e-4)

    print("KERNEL_OK")
</pallas_src>

<mosaic_0001>
module attributes {stable_mosaic.version = 11 : i64} {
  func.func @fused_encoder_kernel(%arg0: i32, %arg1: i32, %arg2: memref<1x8x32xf32, #tpu.memory_space<vmem>>, %arg3: memref<1x8x32xf32, #tpu.memory_space<vmem>>, %arg4: memref<8x8xf32, #tpu.memory_space<vmem>>, %arg5: memref<1x32x64xf32, #tpu.memory_space<vmem>>, %arg6: memref<1x32x32xf32, #tpu.memory_space<vmem>>, %arg7: memref<1x4x8x32xf32, #tpu.memory_space<vmem>>, %arg8: memref<1x1x32xf32, #tpu.memory_space<vmem>>, %arg9: memref<1x4x8x32xf32, #tpu.memory_space<vmem>>, %arg10: memref<1x1x32xf32, #tpu.memory_space<vmem>>, %arg11: memref<1x32x64xf32, #tpu.memory_space<vmem>>, %arg12: memref<1x1x64xf32, #tpu.memory_space<vmem>>, %arg13: memref<1x64x32xf32, #tpu.memory_space<vmem>>, %arg14: memref<1x1x32xf32, #tpu.memory_space<vmem>>, %arg15: memref<1x32x64xf32, #tpu.memory_space<vmem>>, %arg16: memref<1x1x64xf32, #tpu.memory_space<vmem>>, %arg17: memref<1x64x32xf32, #tpu.memory_space<vmem>>, %arg18: memref<1x1x32xf32, #tpu.memory_space<vmem>>, %arg19: memref<1x1x32xf32, #tpu.memory_space<vmem>>, %arg20: memref<1x1x32xf32, #tpu.memory_space<vmem>>, %arg21: memref<1x1x32xf32, #tpu.memory_space<vmem>>, %arg22: memref<1x1x32xf32, #tpu.memory_space<vmem>>, %arg23: memref<1x8x32xf32, #tpu.memory_space<vmem>>, %arg24: memref<1x4x8x8xf32, #tpu.memory_space<vmem>>, %arg25: memref<8x32xf32, #tpu.memory_space<vmem>>, %arg26: memref<8x32xf32, #tpu.memory_space<vmem>>) attributes {dimension_semantics = [#tpu.dimension_semantics<parallel>, #tpu.dimension_semantics<arbitrary>], iteration_bounds = array<i64: 2, 2>, scalar_prefetch = 0 : i64, scratch_operands = 2 : i64, tpu.core_type = #tpu.core_type<tc>, window_params = [{transform_indices = @transform_0, window_bounds = array<i64: 1, 8, 32>}, {transform_indices = @transform_1, window_bounds = array<i64: 1, 8, 32>}, {pipeline_mode = #tpu.pipeline_mode<synchronous>, transform_indices = @transform_2, window_bounds = array<i64: 8, 8>}, {transform_indices = @transform_3, window_bounds = array<i64: 1, 32, 64>}, {transform_indices = @transform_4, window_bounds = array<i64: 1, 32, 32>}, {transform_indices = @transform_5, window_bounds = array<i64: 1, 4, 8, 32>}, {transform_indices = @transform_6, window_bounds = array<i64: 1, 1, 32>}, {transform_indices = @transform_7, window_bounds = array<i64: 1, 4, 8, 32>}, {transform_indices = @transform_8, window_bounds = array<i64: 1, 1, 32>}, {transform_indices = @transform_9, window_bounds = array<i64: 1, 32, 64>}, {transform_indices = @transform_10, window_bounds = array<i64: 1, 1, 64>}, {transform_indices = @transform_11, window_bounds = array<i64: 1, 64, 32>}, {transform_indices = @transform_12, window_bounds = array<i64: 1, 1, 32>}, {transform_indices = @transform_13, window_bounds = array<i64: 1, 32, 64>}, {transform_indices = @transform_14, window_bounds = array<i64: 1, 1, 64>}, {transform_indices = @transform_15, window_bounds = array<i64: 1, 64, 32>}, {transform_indices = @transform_16, window_bounds = array<i64: 1, 1, 32>}, {transform_indices = @transform_17, window_bounds = array<i64: 1, 1, 32>}, {transform_indices = @transform_18, window_bounds = array<i64: 1, 1, 32>}, {transform_indices = @transform_19, window_bounds = array<i64: 1, 1, 32>}, {transform_indices = @transform_20, window_bounds = array<i64: 1, 1, 32>}, {transform_indices = @transform_21, window_bounds = array<i64: 1, 8, 32>}, {transform_indices = @transform_22, window_bounds = array<i64: 1, 4, 8, 8>}]} {
    %c0_i32 = arith.constant 0 : i32
    %0 = arith.cmpi eq, %arg1, %c0_i32 : i32
    %1 = arith.extui %0 : i1 to i32
    %c0_i32_0 = arith.constant 0 : i32
    %2 = arith.cmpi ne, %1, %c0_i32_0 : i32
    scf.if %2 {
      %c0_147 = arith.constant 0 : index
      %c0_148 = arith.constant 0 : index
      %c0_149 = arith.constant 0 : index
      %263 = vector.load %arg2[%c0_147, %c0_148, %c0_149] : memref<1x8x32xf32, #tpu.memory_space<vmem>>, vector<1x8x32xf32>
      %264 = vector.shape_cast %263 : vector<1x8x32xf32> to vector<8x32xf32>
      %c0_150 = arith.constant 0 : index
      %c0_151 = arith.constant 0 : index
      %265 = vector.load %arg25[%c0_150, %c0_151] : memref<8x32xf32, #tpu.memory_space<vmem>>, vector<8x32xf32>
      tpu.vector_store %arg25[%c0_150, %c0_151], %264 {strides = array<i32>} : memref<8x32xf32, #tpu.memory_space<vmem>>, vector<8x32xf32>,
      %c0_152 = arith.constant 0 : index
      %c0_153 = arith.constant 0 : index
      %c0_154 = arith.constant 0 : index
      %266 = vector.load %arg3[%c0_152, %c0_153, %c0_154] : memref<1x8x32xf32, #tpu.memory_space<vmem>>, vector<1x8x32xf32>
      %267 = vector.shape_cast %266 : vector<1x8x32xf32> to vector<8x32xf32>
      %c0_155 = arith.constant 0 : index
      %c0_156 = arith.constant 0 : index
      %268 = vector.load %arg26[%c0_155, %c0_156] : memref<8x32xf32, #tpu.memory_space<vmem>>, vector<8x32xf32>
      tpu.vector_store %arg26[%c0_155, %c0_156], %267 {strides = array<i32>} : memref<8x32xf32, #tpu.memory_space<vmem>>, vector<8x32xf32>,
    } else {
    }
    %c0 = arith.constant 0 : index
    %c0_1 = arith.constant 0 : index
    %3 = vector.load %arg25[%c0, %c0_1] : memref<8x32xf32, #tpu.memory_space<vmem>>, vector<8x32xf32>
    %c0_2 = arith.constant 0 : index
    %c0_3 = arith.constant 0 : index
    %4 = vector.load %arg26[%c0_2, %c0_3] : memref<8x32xf32, #tpu.memory_space<vmem>>, vector<8x32xf32>
    %c0_4 = arith.constant 0 : index
    %c0_5 = arith.constant 0 : index
    %5 = vector.load %arg4[%c0_4, %c0_5] : memref<8x8xf32, #tpu.memory_space<vmem>>, vector<8x8xf32>
    %c0_6 = arith.constant 0 : index
    %c0_7 = arith.constant 0 : index
    %c0_8 = arith.constant 0 : index
    %6 = vector.load %arg5[%c0_6, %c0_7, %c0_8] : memref<1x32x64xf32, #tpu.memory_space<vmem>>, vector<1x32x64xf32>
    %7 = vector.shape_cast %6 : vector<1x32x64xf32> to vector<32x64xf32>
    %cst = arith.constant dense<0.000000e+00> : vector<8x64xf32>
    %8 = tpu.matmul %3, %7, %cst {dimension_numbers = #tpu.dot_dimension_numbers<[1], [0], [0], [1], [0, 0, 1, 1], [], []>} : vector<8x32xf32>, vector<32x64xf32>, vector<8x64xf32> -> vector<8x64xf32>
    %c0_9 = arith.constant 0 : index
    %c0_10 = arith.constant 0 : index
    %c0_11 = arith.constant 0 : index
    %9 = vector.load %arg6[%c0_9, %c0_10, %c0_11] : memref<1x32x32xf32, #tpu.memory_space<vmem>>, vector<1x32x32xf32>
    %10 = vector.shape_cast %9 : vector<1x32x32xf32> to vector<32x32xf32>
    %cst_12 = arith.constant dense<0.000000e+00> : vector<8x32xf32>
    %11 = tpu.matmul %4, %10, %cst_12 {dimension_numbers = #tpu.dot_dimension_numbers<[1], [0], [0], [1], [0, 0, 1, 1], [], []>} : vector<8x32xf32>, vector<32x32xf32>, vector<8x32xf32> -> vector<8x32xf32>
    %12 = vector.extract_strided_slice %8 {offsets = [0, 0], sizes = [8, 8], strides = [1, 1]} : vector<8x64xf32> to vector<8x8xf32>
    %cst_13 = arith.constant 0.353553385 : f32
    %13 = vector.broadcast %cst_13 : f32 to vector<8x8xf32>
    %14 = arith.mulf %12, %13 : vector<8x8xf32>
    %15 = vector.extract_strided_slice %8 {offsets = [0, 32], sizes = [8, 8], strides = [1, 1]} : vector<8x64xf32> to vector<8x8xf32>
    %16 = vector.extract_strided_slice %11 {offsets = [0, 0], sizes = [8, 8], strides = [1, 1]} : vector<8x32xf32> to vector<8x8xf32>
    %17 = tpu.transpose %15, [1, 0] : vector<8x8xf32> -> vector<8x8xf32>
    %cst_14 = arith.constant dense<0.000000e+00> : vector<8x8xf32>
    %18 = tpu.matmul %14, %17, %cst_14 {dimension_numbers = #tpu.dot_dimension_numbers<[1], [0], [0], [1], [0, 0, 1, 1], [], []>} : vector<8x8xf32>, vector<8x8xf32>, vector<8x8xf32> -> vector<8x8xf32>
    %19 = arith.addf %18, %5 : vector<8x8xf32>
    %cst_15 = arith.constant dense<0xFF800000> : vector<8xf32>
    %20 = vector.multi_reduction <maximumf>, %19, %cst_15 [1] : vector<8x8xf32> to vector<8xf32>
    %21 = vector.shape_cast %20 : vector<8xf32> to vector<8x1xf32>
    %22 = vector.broadcast %21 : vector<8x1xf32> to vector<8x8xf32>
    %23 = arith.subf %19, %22 : vector<8x8xf32>
    %24 = math.exp %23 : vector<8x8xf32>
    %cst_16 = arith.constant dense<0.000000e+00> : vector<8xf32>
    %25 = vector.multi_reduction <add>, %24, %cst_16 [1] : vector<8x8xf32> to vector<8xf32>
    %26 = vector.shape_cast %25 : vector<8xf32> to vector<8x1xf32>
    %27 = vector.broadcast %26 : vector<8x1xf32> to vector<8x8xf32>
    %28 = arith.divf %24, %27 : vector<8x8xf32>
    %cst_17 = arith.constant dense<0.000000e+00> : vector<8x8xf32>
    %29 = tpu.matmul %28, %14, %cst_17 {dimension_numbers = #tpu.dot_dimension_numbers<[1], [0], [0], [1], [0, 0, 1, 1], [], []>} : vector<8x8xf32>, vector<8x8xf32>, vector<8x8xf32> -> vector<8x8xf32>
    %cst_18 = arith.constant dense<0.000000e+00> : vector<8x8xf32>
    %30 = tpu.matmul %28, %16, %cst_18 {dimension_numbers = #tpu.dot_dimension_numbers<[1], [0], [0], [1], [0, 0, 1, 1], [], []>} : vector<8x8xf32>, vector<8x8xf32>, vector<8x8xf32> -> vector<8x8xf32>
    %c0_19 = arith.constant 0 : index
    %c0_20 = arith.constant 0 : index
    %c0_21 = arith.constant 0 : index
    %c0_22 = arith.constant 0 : index
    %31 = vector.load %arg7[%c0_19, %c0_20, %c0_21, %c0_22] : memref<1x4x8x32xf32, #tpu.memory_space<vmem>>, vector<1x1x8x32xf32>
    %32 = vector.shape_cast %31 : vector<1x1x8x32xf32> to vector<8x32xf32>
    %cst_23 = arith.constant dense<0.000000e+00> : vector<8x32xf32>
    %33 = tpu.matmul %29, %32, %cst_23 {dimension_numbers = #tpu.dot_dimension_numbers<[1], [0], [0], [1], [0, 0, 1, 1], [], []>} : vector<8x8xf32>, vector<8x32xf32>, vector<8x32xf32> -> vector<8x32xf32>
    %c0_24 = arith.constant 0 : index
    %c0_25 = arith.constant 0 : index
    %c0_26 = arith.constant 0 : index
    %c0_27 = arith.constant 0 : index
    %34 = vector.load %arg9[%c0_24, %c0_25, %c0_26, %c0_27] : memref<1x4x8x32xf32, #tpu.memory_space<vmem>>, vector<1x1x8x32xf32>
    %35 = vector.shape_cast %34 : vector<1x1x8x32xf32> to vector<8x32xf32>
    %cst_28 = arith.constant dense<0.000000e+00> : vector<8x32xf32>
    %36 = tpu.matmul %30, %35, %cst_28 {dimension_numbers = #tpu.dot_dimension_numbers<[1], [0], [0], [1], [0, 0, 1, 1], [], []>} : vector<8x8xf32>, vector<8x32xf32>, vector<8x32xf32> -> vector<8x32xf32>
    %37 = vector.extract_strided_slice %8 {offsets = [0, 8], sizes = [8, 8], strides = [1, 1]} : vector<8x64xf32> to vector<8x8xf32>
    %cst_29 = arith.constant 0.353553385 : f32
    %38 = vector.broadcast %cst_29 : f32 to vector<8x8xf32>
    %39 = arith.mulf %37, %38 : vector<8x8xf32>
    %40 = vector.extract_strided_slice %8 {offsets = [0, 40], sizes = [8, 8], strides = [1, 1]} : vector<8x64xf32> to vector<8x8xf32>
    %41 = vector.extract_strided_slice %11 {offsets = [0, 8], sizes = [8, 8], strides = [1, 1]} : vector<8x32xf32> to vector<8x8xf32>
    %42 = tpu.transpose %40, [1, 0] : vector<8x8xf32> -> vector<8x8xf32>
    %cst_30 = arith.constant dense<0.000000e+00> : vector<8x8xf32>
    %43 = tpu.matmul %39, %42, %cst_30 {dimension_numbers = #tpu.dot_dimension_numbers<[1], [0], [0], [1], [0, 0, 1, 1], [], []>} : vector<8x8xf32>, vector<8x8xf32>, vector<8x8xf32> -> vector<8x8xf32>
    %44 = arith.addf %43, %5 : vector<8x8xf32>
    %cst_31 = arith.constant dense<0xFF800000> : vector<8xf32>
    %45 = vector.multi_reduction <maximumf>, %44, %cst_31 [1] : vector<8x8xf32> to vector<8xf32>
    %46 = vector.shape_cast %45 : vector<8xf32> to vector<8x1xf32>
    %47 = vector.broadcast %46 : vector<8x1xf32> to vector<8x8xf32>
    %48 = arith.subf %44, %47 : vector<8x8xf32>
    %49 = math.exp %48 : vector<8x8xf32>
    %cst_32 = arith.constant dense<0.000000e+00> : vector<8xf32>
    %50 = vector.multi_reduction <add>, %49, %cst_32 [1] : vector<8x8xf32> to vector<8xf32>
    %51 = vector.shape_cast %50 : vector<8xf32> to vector<8x1xf32>
    %52 = vector.broadcast %51 : vector<8x1xf32> to vector<8x8xf32>
    %53 = arith.divf %49, %52 : vector<8x8xf32>
    %cst_33 = arith.constant dense<0.000000e+00> : vector<8x8xf32>
    %54 = tpu.matmul %53, %39, %cst_33 {dimension_numbers = #tpu.dot_dimension_numbers<[1], [0], [0], [1], [0, 0, 1, 1], [], []>} : vector<8x8xf32>, vector<8x8xf32>, vector<8x8xf32> -> vector<8x8xf32>
    %cst_34 = arith.constant dense<0.000000e+00> : vector<8x8xf32>
    %55 = tpu.matmul %53, %41, %cst_34 {dimension_numbers = #tpu.dot_dimension_numbers<[1], [0], [0], [1], [0, 0, 1, 1], [], []>} : vector<8x8xf32>, vector<8x8xf32>, vector<8x8xf32> -> vector<8x8xf32>
    %c0_35 = arith.constant 0 : index
    %c1 = arith.constant 1 : index
    %c0_36 = arith.constant 0 : index
    %c0_37 = arith.constant 0 : index
    %56 = vector.load %arg7[%c0_35, %c1, %c0_36, %c0_37] : memref<1x4x8x32xf32, #tpu.memory_space<vmem>>, vector<1x1x8x32xf32>
    %57 = vector.shape_cast %56 : vector<1x1x8x32xf32> to vector<8x32xf32>
    %cst_38 = arith.constant dense<0.000000e+00> : vector<8x32xf32>
    %58 = tpu.matmul %54, %57, %cst_38 {dimension_numbers = #tpu.dot_dimension_numbers<[1], [0], [0], [1], [0, 0, 1, 1], [], []>} : vector<8x8xf32>, vector<8x32xf32>, vector<8x32xf32> -> vector<8x32xf32>
    %c0_39 = arith.constant 0 : index
    %c1_40 = arith.constant 1 : index
    %c0_41 = arith.constant 0 : index
    %c0_42 = arith.constant 0 : index
    %59 = vector.load %arg9[%c0_39, %c1_40, %c0_41, %c0_42] : memref<1x4x8x32xf32, #tpu.memory_space<vmem>>, vector<1x1x8x32xf32>
    %60 = vector.shape_cast %59 : vector<1x1x8x32xf32> to vector<8x32xf32>
    %cst_43 = arith.constant dense<0.000000e+00> : vector<8x32xf32>
    %61 = tpu.matmul %55, %60, %cst_43 {dimension_numbers = #tpu.dot_dimension_numbers<[1], [0], [0], [1], [0, 0, 1, 1], [], []>} : vector<8x8xf32>, vector<8x32xf32>, vector<8x32xf32> -> vector<8x32xf32>
    %62 = arith.addf %33, %58 : vector<8x32xf32>
    %63 = arith.addf %36, %61 : vector<8x32xf32>
    %64 = vector.extract_strided_slice %8 {offsets = [0, 16], sizes = [8, 8], strides = [1, 1]} : vector<8x64xf32> to vector<8x8xf32>
    %cst_44 = arith.constant 0.353553385 : f32
    %65 = vector.broadcast %cst_44 : f32 to vector<8x8xf32>
    %66 = arith.mulf %64, %65 : vector<8x8xf32>
    %67 = vector.extract_strided_slice %8 {offsets = [0, 48], sizes = [8, 8], strides = [1, 1]} : vector<8x64xf32> to vector<8x8xf32>
    %68 = vector.extract_strided_slice %11 {offsets = [0, 16], sizes = [8, 8], strides = [1, 1]} : vector<8x32xf32> to vector<8x8xf32>
    %69 = tpu.transpose %67, [1, 0] : vector<8x8xf32> -> vector<8x8xf32>
    %cst_45 = arith.constant dense<0.000000e+00> : vector<8x8xf32>
    %70 = tpu.matmul %66, %69, %cst_45 {dimension_numbers = #tpu.dot_dimension_numbers<[1], [0], [0], [1], [0, 0, 1, 1], [], []>} : vector<8x8xf32>, vector<8x8xf32>, vector<8x8xf32> -> vector<8x8xf32>
    %71 = arith.addf %70, %5 : vector<8x8xf32>
    %cst_46 = arith.constant dense<0xFF800000> : vector<8xf32>
    %72 = vector.multi_reduction <maximumf>, %71, %cst_46 [1] : vector<8x8xf32> to vector<8xf32>
    %73 = vector.shape_cast %72 : vector<8xf32> to vector<8x1xf32>
    %74 = vector.broadcast %73 : vector<8x1xf32> to vector<8x8xf32>
    %75 = arith.subf %71, %74 : vector<8x8xf32>
    %76 = math.exp %75 : vector<8x8xf32>
    %cst_47 = arith.constant dense<0.000000e+00> : vector<8xf32>
    %77 = vector.multi_reduction <add>, %76, %cst_47 [1] : vector<8x8xf32> to vector<8xf32>
    %78 = vector.shape_cast %77 : vector<8xf32> to vector<8x1xf32>
    %79 = vector.broadcast %78 : vector<8x1xf32> to vector<8x8xf32>
    %80 = arith.divf %76, %79 : vector<8x8xf32>
    %cst_48 = arith.constant dense<0.000000e+00> : vector<8x8xf32>
    %81 = tpu.matmul %80, %66, %cst_48 {dimension_numbers = #tpu.dot_dimension_numbers<[1], [0], [0], [1], [0, 0, 1, 1], [], []>} : vector<8x8xf32>, vector<8x8xf32>, vector<8x8xf32> -> vector<8x8xf32>
    %cst_49 = arith.constant dense<0.000000e+00> : vector<8x8xf32>
    %82 = tpu.matmul %80, %68, %cst_49 {dimension_numbers = #tpu.dot_dimension_numbers<[1], [0], [0], [1], [0, 0, 1, 1], [], []>} : vector<8x8xf32>, vector<8x8xf32>, vector<8x8xf32> -> vector<8x8xf32>
    %c0_50 = arith.constant 0 : index
    %c2 = arith.constant 2 : index
    %c0_51 = arith.constant 0 : index
    %c0_52 = arith.constant 0 : index
    %83 = vector.load %arg7[%c0_50, %c2, %c0_51, %c0_52] : memref<1x4x8x32xf32, #tpu.memory_space<vmem>>, vector<1x1x8x32xf32>
    %84 = vector.shape_cast %83 : vector<1x1x8x32xf32> to vector<8x32xf32>
    %cst_53 = arith.constant dense<0.000000e+00> : vector<8x32xf32>
    %85 = tpu.matmul %81, %84, %cst_53 {dimension_numbers = #tpu.dot_dimension_numbers<[1], [0], [0], [1], [0, 0, 1, 1], [], []>} : vector<8x8xf32>, vector<8x32xf32>, vector<8x32xf32> -> vector<8x32xf32>
    %c0_54 = arith.constant 0 : index
    %c2_55 = arith.constant 2 : index
    %c0_56 = arith.constant 0 : index
    %c0_57 = arith.constant 0 : index
    %86 = vector.load %arg9[%c0_54, %c2_55, %c0_56, %c0_57] : memref<1x4x8x32xf32, #tpu.memory_space<vmem>>, vector<1x1x8x32xf32>
    %87 = vector.shape_cast %86 : vector<1x1x8x32xf32> to vector<8x32xf32>
    %cst_58 = arith.constant dense<0.000000e+00> : vector<8x32xf32>
    %88 = tpu.matmul %82, %87, %cst_58 {dimension_numbers = #tpu.dot_dimension_numbers<[1], [0], [0], [1], [0, 0, 1, 1], [], []>} : vector<8x8xf32>, vector<8x32xf32>, vector<8x32xf32> -> vector<8x32xf32>
    %89 = arith.addf %62, %85 : vector<8x32xf32>
    %90 = arith.addf %63, %88 : vector<8x32xf32>
    %91 = vector.extract_strided_slice %8 {offsets = [0, 24], sizes = [8, 8], strides = [1, 1]} : vector<8x64xf32> to vector<8x8xf32>
    %cst_59 = arith.constant 0.353553385 : f32
    %92 = vector.broadcast %cst_59 : f32 to vector<8x8xf32>
    %93 = arith.mulf %91, %92 : vector<8x8xf32>
    %94 = vector.extract_strided_slice %8 {offsets = [0, 56], sizes = [8, 8], strides = [1, 1]} : vector<8x64xf32> to vector<8x8xf32>
    %95 = vector.extract_strided_slice %11 {offsets = [0, 24], sizes = [8, 8], strides = [1, 1]} : vector<8x32xf32> to vector<8x8xf32>
    %96 = tpu.transpose %94, [1, 0] : vector<8x8xf32> -> vector<8x8xf32>
    %cst_60 = arith.constant dense<0.000000e+00> : vector<8x8xf32>
    %97 = tpu.matmul %93, %96, %cst_60 {dimension_numbers = #tpu.dot_dimension_numbers<[1], [0], [0], [1], [0, 0, 1, 1], [], []>} : vector<8x8xf32>, vector<8x8xf32>, vector<8x8xf32> -> vector<8x8xf32>
    %98 = arith.addf %97, %5 : vector<8x8xf32>
    %cst_61 = arith.constant dense<0xFF800000> : vector<8xf32>
    %99 = vector.multi_reduction <maximumf>, %98, %cst_61 [1] : vector<8x8xf32> to vector<8xf32>
    %100 = vector.shape_cast %99 : vector<8xf32> to vector<8x1xf32>
    %101 = vector.broadcast %100 : vector<8x1xf32> to vector<8x8xf32>
    %102 = arith.subf %98, %101 : vector<8x8xf32>
    %103 = math.exp %102 : vector<8x8xf32>
    %cst_62 = arith.constant dense<0.000000e+00> : vector<8xf32>
    %104 = vector.multi_reduction <add>, %103, %cst_62 [1] : vector<8x8xf32> to vector<8xf32>
    %105 = vector.shape_cast %104 : vector<8xf32> to vector<8x1xf32>
    %106 = vector.broadcast %105 : vector<8x1xf32> to vector<8x8xf32>
    %107 = arith.divf %103, %106 : vector<8x8xf32>
    %cst_63 = arith.constant dense<0.000000e+00> : vector<8x8xf32>
    %108 = tpu.matmul %107, %93, %cst_63 {dimension_numbers = #tpu.dot_dimension_numbers<[1], [0], [0], [1], [0, 0, 1, 1], [], []>} : vector<8x8xf32>, vector<8x8xf32>, vector<8x8xf32> -> vector<8x8xf32>
    %cst_64 = arith.constant dense<0.000000e+00> : vector<8x8xf32>
    %109 = tpu.matmul %107, %95, %cst_64 {dimension_numbers = #tpu.dot_dimension_numbers<[1], [0], [0], [1], [0, 0, 1, 1], [], []>} : vector<8x8xf32>, vector<8x8xf32>, vector<8x8xf32> -> vector<8x8xf32>
    %c0_65 = arith.constant 0 : index
    %c3 = arith.constant 3 : index
    %c0_66 = arith.constant 0 : index
    %c0_67 = arith.constant 0 : index
    %110 = vector.load %arg7[%c0_65, %c3, %c0_66, %c0_67] : memref<1x4x8x32xf32, #tpu.memory_space<vmem>>, vector<1x1x8x32xf32>
    %111 = vector.shape_cast %110 : vector<1x1x8x32xf32> to vector<8x32xf32>
    %cst_68 = arith.constant dense<0.000000e+00> : vector<8x32xf32>
    %112 = tpu.matmul %108, %111, %cst_68 {dimension_numbers = #tpu.dot_dimension_numbers<[1], [0], [0], [1], [0, 0, 1, 1], [], []>} : vector<8x8xf32>, vector<8x32xf32>, vector<8x32xf32> -> vector<8x32xf32>
    %c0_69 = arith.constant 0 : index
    %c3_70 = arith.constant 3 : index
    %c0_71 = arith.constant 0 : index
    %c0_72 = arith.constant 0 : index
    %113 = vector.load %arg9[%c0_69, %c3_70, %c0_71, %c0_72] : memref<1x4x8x32xf32, #tpu.memory_space<vmem>>, vector<1x1x8x32xf32>
    %114 = vector.shape_cast %113 : vector<1x1x8x32xf32> to vector<8x32xf32>
    %cst_73 = arith.constant dense<0.000000e+00> : vector<8x32xf32>
    %115 = tpu.matmul %109, %114, %cst_73 {dimension_numbers = #tpu.dot_dimension_numbers<[1], [0], [0], [1], [0, 0, 1, 1], [], []>} : vector<8x8xf32>, vector<8x32xf32>, vector<8x32xf32> -> vector<8x32xf32>
    %116 = arith.addf %89, %112 : vector<8x32xf32>
    %117 = arith.addf %90, %115 : vector<8x32xf32>
    %c0_74 = arith.constant 0 : index
    %c0_75 = arith.constant 0 : index
    %c0_76 = arith.constant 0 : index
    %118 = vector.load %arg8[%c0_74, %c0_75, %c0_76] : memref<1x1x32xf32, #tpu.memory_space<vmem>>, vector<1x1x32xf32>
    %119 = vector.shape_cast %118 : vector<1x1x32xf32> to vector<1x32xf32>
    %120 = vector.broadcast %119 : vector<1x32xf32> to vector<8x32xf32>
    %121 = arith.addf %116, %120 : vector<8x32xf32>
    %c0_77 = arith.constant 0 : index
    %c0_78 = arith.constant 0 : index
    %c0_79 = arith.constant 0 : index
    %122 = vector.load %arg10[%c0_77, %c0_78, %c0_79] : memref<1x1x32xf32, #tpu.memory_space<vmem>>, vector<1x1x32xf32>
    %123 = vector.shape_cast %122 : vector<1x1x32xf32> to vector<1x32xf32>
    %124 = vector.broadcast %123 : vector<1x32xf32> to vector<8x32xf32>
    %125 = arith.addf %117, %124 : vector<8x32xf32>
    %c0_80 = arith.constant 0 : index
    %c0_81 = arith.constant 0 : index
    %c0_82 = arith.constant 0 : index
    %126 = vector.load %arg19[%c0_80, %c0_81, %c0_82] : memref<1x1x32xf32, #tpu.memory_space<vmem>>, vector<1x1x32xf32>
    %127 = vector.shape_cast %126 : vector<1x1x32xf32> to vector<1x32xf32>
    %c0_83 = arith.constant 0 : index
    %c0_84 = arith.constant 0 : index
    %c0_85 = arith.constant 0 : index
    %128 = vector.load %arg20[%c0_83, %c0_84, %c0_85] : memref<1x1x32xf32, #tpu.memory_space<vmem>>, vector<1x1x32xf32>
    %129 = vector.shape_cast %128 : vector<1x1x32xf32> to vector<1x32xf32>
    %c0_86 = arith.constant 0 : index
    %c0_87 = arith.constant 0 : index
    %c0_88 = arith.constant 0 : index
    %130 = vector.load %arg21[%c0_86, %c0_87, %c0_88] : memref<1x1x32xf32, #tpu.memory_space<vmem>>, vector<1x1x32xf32>
    %131 = vector.shape_cast %130 : vector<1x1x32xf32> to vector<1x32xf32>
    %c0_89 = arith.constant 0 : index
    %c0_90 = arith.constant 0 : index
    %c0_91 = arith.constant 0 : index
    %132 = vector.load %arg22[%c0_89, %c0_90, %c0_91] : memref<1x1x32xf32, #tpu.memory_space<vmem>>, vector<1x1x32xf32>
    %133 = vector.shape_cast %132 : vector<1x1x32xf32> to vector<1x32xf32>
    %134 = arith.addf %3, %121 : vector<8x32xf32>
    %cst_92 = arith.constant dense<0.000000e+00> : vector<8xf32>
    %135 = vector.multi_reduction <add>, %134, %cst_92 [1] : vector<8x32xf32> to vector<8xf32>
    %136 = vector.shape_cast %135 : vector<8xf32> to vector<8x1xf32>
    %cst_93 = arith.constant 3.200000e+01 : f32
    %137 = vector.broadcast %cst_93 : f32 to vector<8x1xf32>
    %138 = arith.divf %136, %137 : vector<8x1xf32>
    %139 = vector.broadcast %138 : vector<8x1xf32> to vector<8x32xf32>
    %140 = arith.subf %134, %139 : vector<8x32xf32>
    %141 = arith.mulf %140, %140 : vector<8x32xf32>
    %cst_94 = arith.constant dense<0.000000e+00> : vector<8xf32>
    %142 = vector.multi_reduction <add>, %141, %cst_94 [1] : vector<8x32xf32> to vector<8xf32>
    %143 = vector.shape_cast %142 : vector<8xf32> to vector<8x1xf32>
    %cst_95 = arith.constant 3.200000e+01 : f32
    %144 = vector.broadcast %cst_95 : f32 to vector<8x1xf32>
    %145 = arith.divf %143, %144 : vector<8x1xf32>
    %146 = vector.broadcast %138 : vector<8x1xf32> to vector<8x32xf32>
    %147 = arith.subf %134, %146 : vector<8x32xf32>
    %cst_96 = arith.constant 9.99999997E-7 : f32
    %148 = vector.broadcast %cst_96 : f32 to vector<8x1xf32>
    %149 = arith.addf %145, %148 : vector<8x1xf32>
    %150 = math.rsqrt %149 : vector<8x1xf32>
    %151 = vector.broadcast %150 : vector<8x1xf32> to vector<8x32xf32>
    %152 = arith.mulf %147, %151 : vector<8x32xf32>
    %153 = vector.broadcast %127 : vector<1x32xf32> to vector<8x32xf32>
    %154 = arith.mulf %152, %153 : vector<8x32xf32>
    %155 = vector.broadcast %129 : vector<1x32xf32> to vector<8x32xf32>
    %156 = arith.addf %154, %155 : vector<8x32xf32>
    %c0_97 = arith.constant 0 : index
    %c0_98 = arith.constant 0 : index
    %c0_99 = arith.constant 0 : index
    %157 = vector.load %arg11[%c0_97, %c0_98, %c0_99] : memref<1x32x64xf32, #tpu.memory_space<vmem>>, vector<1x32x64xf32>
    %158 = vector.shape_cast %157 : vector<1x32x64xf32> to vector<32x64xf32>
    %cst_100 = arith.constant dense<0.000000e+00> : vector<8x64xf32>
    %159 = tpu.matmul %156, %158, %cst_100 {dimension_numbers = #tpu.dot_dimension_numbers<[1], [0], [0], [1], [0, 0, 1, 1], [], []>} : vector<8x32xf32>, vector<32x64xf32>, vector<8x64xf32> -> vector<8x64xf32>
    %c0_101 = arith.constant 0 : index
    %c0_102 = arith.constant 0 : index
    %c0_103 = arith.constant 0 : index
    %160 = vector.load %arg12[%c0_101, %c0_102, %c0_103] : memref<1x1x64xf32, #tpu.memory_space<vmem>>, vector<1x1x64xf32>
    %161 = vector.shape_cast %160 : vector<1x1x64xf32> to vector<1x64xf32>
    %162 = vector.broadcast %161 : vector<1x64xf32> to vector<8x64xf32>
    %163 = arith.addf %159, %162 : vector<8x64xf32>
    %cst_104 = arith.constant 0.000000e+00 : f32
    %164 = vector.broadcast %cst_104 : f32 to vector<8x64xf32>
    %165 = arith.maximumf %163, %164 : vector<8x64xf32>
    %c0_105 = arith.constant 0 : index
    %c0_106 = arith.constant 0 : index
    %c0_107 = arith.constant 0 : index
    %166 = vector.load %arg13[%c0_105, %c0_106, %c0_107] : memref<1x64x32xf32, #tpu.memory_space<vmem>>, vector<1x64x32xf32>
    %167 = vector.shape_cast %166 : vector<1x64x32xf32> to vector<64x32xf32>
    %cst_108 = arith.constant dense<0.000000e+00> : vector<8x32xf32>
    %168 = tpu.matmul %165, %167, %cst_108 {dimension_numbers = #tpu.dot_dimension_numbers<[1], [0], [0], [1], [0, 0, 1, 1], [], []>} : vector<8x64xf32>, vector<64x32xf32>, vector<8x32xf32> -> vector<8x32xf32>
    %c0_109 = arith.constant 0 : index
    %c0_110 = arith.constant 0 : index
    %c0_111 = arith.constant 0 : index
    %169 = vector.load %arg14[%c0_109, %c0_110, %c0_111] : memref<1x1x32xf32, #tpu.memory_space<vmem>>, vector<1x1x32xf32>
    %170 = vector.shape_cast %169 : vector<1x1x32xf32> to vector<1x32xf32>
    %171 = vector.broadcast %170 : vector<1x32xf32> to vector<8x32xf32>
    %172 = arith.addf %168, %171 : vector<8x32xf32>
    %173 = arith.addf %156, %172 : vector<8x32xf32>
    %cst_112 = arith.constant dense<0.000000e+00> : vector<8xf32>
    %174 = vector.multi_reduction <add>, %173, %cst_112 [1] : vector<8x32xf32> to vector<8xf32>
    %175 = vector.shape_cast %174 : vector<8xf32> to vector<8x1xf32>
    %cst_113 = arith.constant 3.200000e+01 : f32
    %176 = vector.broadcast %cst_113 : f32 to vector<8x1xf32>
    %177 = arith.divf %175, %176 : vector<8x1xf32>
    %178 = vector.broadcast %177 : vector<8x1xf32> to vector<8x32xf32>
    %179 = arith.subf %173, %178 : vector<8x32xf32>
    %180 = arith.mulf %179, %179 : vector<8x32xf32>
    %cst_114 = arith.constant dense<0.000000e+00> : vector<8xf32>
    %181 = vector.multi_reduction <add>, %180, %cst_114 [1] : vector<8x32xf32> to vector<8xf32>
    %182 = vector.shape_cast %181 : vector<8xf32> to vector<8x1xf32>
    %cst_115 = arith.constant 3.200000e+01 : f32
    %183 = vector.broadcast %cst_115 : f32 to vector<8x1xf32>
    %184 = arith.divf %182, %183 : vector<8x1xf32>
    %185 = vector.broadcast %177 : vector<8x1xf32> to vector<8x32xf32>
    %186 = arith.subf %173, %185 : vector<8x32xf32>
    %cst_116 = arith.constant 9.99999997E-7 : f32
    %187 = vector.broadcast %cst_116 : f32 to vector<8x1xf32>
    %188 = arith.addf %184, %187 : vector<8x1xf32>
    %189 = math.rsqrt %188 : vector<8x1xf32>
    %190 = vector.broadcast %189 : vector<8x1xf32> to vector<8x32xf32>
    %191 = arith.mulf %186, %190 : vector<8x32xf32>
    %192 = vector.broadcast %131 : vector<1x32xf32> to vector<8x32xf32>
    %193 = arith.mulf %191, %192 : vector<8x32xf32>
    %194 = vector.broadcast %133 : vector<1x32xf32> to vector<8x32xf32>
    %195 = arith.addf %193, %194 : vector<8x32xf32>
    %196 = arith.addf %4, %125 : vector<8x32xf32>
    %cst_117 = arith.constant dense<0.000000e+00> : vector<8xf32>
    %197 = vector.multi_reduction <add>, %196, %cst_117 [1] : vector<8x32xf32> to vector<8xf32>
    %198 = vector.shape_cast %197 : vector<8xf32> to vector<8x1xf32>
    %cst_118 = arith.constant 3.200000e+01 : f32
    %199 = vector.broadcast %cst_118 : f32 to vector<8x1xf32>
    %200 = arith.divf %198, %199 : vector<8x1xf32>
    %201 = vector.broadcast %200 : vector<8x1xf32> to vector<8x32xf32>
    %202 = arith.subf %196, %201 : vector<8x32xf32>
    %203 = arith.mulf %202, %202 : vector<8x32xf32>
    %cst_119 = arith.constant dense<0.000000e+00> : vector<8xf32>
    %204 = vector.multi_reduction <add>, %203, %cst_119 [1] : vector<8x32xf32> to vector<8xf32>
    %205 = vector.shape_cast %204 : vector<8xf32> to vector<8x1xf32>
    %cst_120 = arith.constant 3.200000e+01 : f32
    %206 = vector.broadcast %cst_120 : f32 to vector<8x1xf32>
    %207 = arith.divf %205, %206 : vector<8x1xf32>
    %208 = vector.broadcast %200 : vector<8x1xf32> to vector<8x32xf32>
    %209 = arith.subf %196, %208 : vector<8x32xf32>
    %cst_121 = arith.constant 9.99999997E-7 : f32
    %210 = vector.broadcast %cst_121 : f32 to vector<8x1xf32>
    %211 = arith.addf %207, %210 : vector<8x1xf32>
    %212 = math.rsqrt %211 : vector<8x1xf32>
    %213 = vector.broadcast %212 : vector<8x1xf32> to vector<8x32xf32>
    %214 = arith.mulf %209, %213 : vector<8x32xf32>
    %215 = vector.broadcast %127 : vector<1x32xf32> to vector<8x32xf32>
    %216 = arith.mulf %214, %215 : vector<8x32xf32>
    %217 = vector.broadcast %129 : vector<1x32xf32> to vector<8x32xf32>
    %218 = arith.addf %216, %217 : vector<8x32xf32>
    %c0_122 = arith.constant 0 : index
    %c0_123 = arith.constant 0 : index
    %c0_124 = arith.constant 0 : index
    %219 = vector.load %arg15[%c0_122, %c0_123, %c0_124] : memref<1x32x64xf32, #tpu.memory_space<vmem>>, vector<1x32x64xf32>
    %220 = vector.shape_cast %219 : vector<1x32x64xf32> to vector<32x64xf32>
    %cst_125 = arith.constant dense<0.000000e+00> : vector<8x64xf32>
    %221 = tpu.matmul %218, %220, %cst_125 {dimension_numbers = #tpu.dot_dimension_numbers<[1], [0], [0], [1], [0, 0, 1, 1], [], []>} : vector<8x32xf32>, vector<32x64xf32>, vector<8x64xf32> -> vector<8x64xf32>
    %c0_126 = arith.constant 0 : index
    %c0_127 = arith.constant 0 : index
    %c0_128 = arith.constant 0 : index
    %222 = vector.load %arg16[%c0_126, %c0_127, %c0_128] : memref<1x1x64xf32, #tpu.memory_space<vmem>>, vector<1x1x64xf32>
    %223 = vector.shape_cast %222 : vector<1x1x64xf32> to vector<1x64xf32>
    %224 = vector.broadcast %223 : vector<1x64xf32> to vector<8x64xf32>
    %225 = arith.addf %221, %224 : vector<8x64xf32>
    %cst_129 = arith.constant 0.000000e+00 : f32
    %226 = vector.broadcast %cst_129 : f32 to vector<8x64xf32>
    %227 = arith.maximumf %225, %226 : vector<8x64xf32>
    %c0_130 = arith.constant 0 : index
    %c0_131 = arith.constant 0 : index
    %c0_132 = arith.constant 0 : index
    %228 = vector.load %arg17[%c0_130, %c0_131, %c0_132] : memref<1x64x32xf32, #tpu.memory_space<vmem>>, vector<1x64x32xf32>
    %229 = vector.shape_cast %228 : vector<1x64x32xf32> to vector<64x32xf32>
    %cst_133 = arith.constant dense<0.000000e+00> : vector<8x32xf32>
    %230 = tpu.matmul %227, %229, %cst_133 {dimension_numbers = #tpu.dot_dimension_numbers<[1], [0], [0], [1], [0, 0, 1, 1], [], []>} : vector<8x64xf32>, vector<64x32xf32>, vector<8x32xf32> -> vector<8x32xf32>
    %c0_134 = arith.constant 0 : index
    %c0_135 = arith.constant 0 : index
    %c0_136 = arith.constant 0 : index
    %231 = vector.load %arg18[%c0_134, %c0_135, %c0_136] : memref<1x1x32xf32, #tpu.memory_space<vmem>>, vector<1x1x32xf32>
    %232 = vector.shape_cast %231 : vector<1x1x32xf32> to vector<1x32xf32>
    %233 = vector.broadcast %232 : vector<1x32xf32> to vector<8x32xf32>
    %234 = arith.addf %230, %233 : vector<8x32xf32>
    %235 = arith.addf %218, %234 : vector<8x32xf32>
    %cst_137 = arith.constant dense<0.000000e+00> : vector<8xf32>
    %236 = vector.multi_reduction <add>, %235, %cst_137 [1] : vector<8x32xf32> to vector<8xf32>
    %237 = vector.shape_cast %236 : vector<8xf32> to vector<8x1xf32>
    %cst_138 = arith.constant 3.200000e+01 : f32
    %238 = vector.broadcast %cst_138 : f32 to vector<8x1xf32>
    %239 = arith.divf %237, %238 : vector<8x1xf32>
    %240 = vector.broadcast %239 : vector<8x1xf32> to vector<8x32xf32>
    %241 = arith.subf %235, %240 : vector<8x32xf32>
    %242 = arith.mulf %241, %241 : vector<8x32xf32>
    %cst_139 = arith.constant dense<0.000000e+00> : vector<8xf32>
    %243 = vector.multi_reduction <add>, %242, %cst_139 [1] : vector<8x32xf32> to vector<8xf32>
    %244 = vector.shape_cast %243 : vector<8xf32> to vector<8x1xf32>
    %cst_140 = arith.constant 3.200000e+01 : f32
    %245 = vector.broadcast %cst_140 : f32 to vector<8x1xf32>
    %246 = arith.divf %244, %245 : vector<8x1xf32>
    %247 = vector.broadcast %239 : vector<8x1xf32> to vector<8x32xf32>
    %248 = arith.subf %235, %247 : vector<8x32xf32>
    %cst_141 = arith.constant 9.99999997E-7 : f32
    %249 = vector.broadcast %cst_141 : f32 to vector<8x1xf32>
    %250 = arith.addf %246, %249 : vector<8x1xf32>
    %251 = math.rsqrt %250 : vector<8x1xf32>
    %252 = vector.broadcast %251 : vector<8x1xf32> to vector<8x32xf32>
    %253 = arith.mulf %248, %252 : vector<8x32xf32>
    %254 = vector.broadcast %131 : vector<1x32xf32> to vector<8x32xf32>
    %255 = arith.mulf %253, %254 : vector<8x32xf32>
    %256 = vector.broadcast %133 : vector<1x32xf32> to vector<8x32xf32>
    %257 = arith.addf %255, %256 : vector<8x32xf32>
    %c0_142 = arith.constant 0 : index
    %c0_143 = arith.constant 0 : index
    %258 = vector.load %arg25[%c0_142, %c0_143] : memref<8x32xf32, #tpu.memory_space<vmem>>, vector<8x32xf32>
    tpu.vector_store %arg25[%c0_142, %c0_143], %195 {strides = array<i32>} : memref<8x32xf32, #tpu.memory_space<vmem>>, vector<8x32xf32>,
    %c0_144 = arith.constant 0 : index
    %c0_145 = arith.constant 0 : index
    %259 = vector.load %arg26[%c0_144, %c0_145] : memref<8x32xf32, #tpu.memory_space<vmem>>, vector<8x32xf32>
    tpu.vector_store %arg26[%c0_144, %c0_145], %257 {strides = array<i32>} : memref<8x32xf32, #tpu.memory_space<vmem>>, vector<8x32xf32>,
    %c1_i32 = arith.constant 1 : i32
    %260 = arith.cmpi eq, %arg1, %c1_i32 : i32
    %261 = arith.extui %260 : i1 to i32
    %c0_i32_146 = arith.constant 0 : i32
    %262 = arith.cmpi ne, %261, %c0_i32_146 : i32
    scf.if %262 {
      %c0_147 = arith.constant 0 : index
      %c0_148 = arith.constant 0 : index
      %c0_149 = arith.constant 0 : index
      %263 = vector.load %arg23[%c0_147, %c0_148, %c0_149] : memref<1x8x32xf32, #tpu.memory_space<vmem>>, vector<1x8x32xf32>
      %264 = vector.shape_cast %263 : vector<1x8x32xf32> to vector<8x32xf32>
      %265 = vector.shape_cast %257 : vector<8x32xf32> to vector<1x8x32xf32>
      tpu.vector_store %arg23[%c0_147, %c0_148, %c0_149], %265 {strides = array<i32>} : memref<1x8x32xf32, #tpu.memory_space<vmem>>, vector<1x8x32xf32>,
      %266 = vector.shape_cast %28 : vector<8x8xf32> to vector<1x8x8xf32>
      %267 = vector.shape_cast %53 : vector<8x8xf32> to vector<1x8x8xf32>
      %268 = vector.shape_cast %80 : vector<8x8xf32> to vector<1x8x8xf32>
      %269 = vector.shape_cast %107 : vector<8x8xf32> to vector<1x8x8xf32>
      %270 = tpu.concatenate %266, %267, %268, %269 in 0 : vector<1x8x8xf32>, vector<1x8x8xf32>, vector<1x8x8xf32>, vector<1x8x8xf32> -> vector<4x8x8xf32>
      %c0_150 = arith.constant 0 : index
      %c0_151 = arith.constant 0 : index
      %c0_152 = arith.constant 0 : index
      %c0_153 = arith.constant 0 : index
      %271 = vector.load %arg24[%c0_150, %c0_151, %c0_152, %c0_153] : memref<1x4x8x8xf32, #tpu.memory_space<vmem>>, vector<1x4x8x8xf32>
      %272 = vector.shape_cast %271 : vector<1x4x8x8xf32> to vector<4x8x8xf32>
      %273 = vector.shape_cast %270 : vector<4x8x8xf32> to vector<1x4x8x8xf32>
      tpu.vector_store %arg24[%c0_150, %c0_151, %c0_152, %c0_153], %273 {strides = array<i32>} : memref<1x4x8x8xf32, #tpu.memory_space<vmem>>, vector<1x4x8x8xf32>,
    } else {
    }
    return
  }
  func.func @transform_0(%arg0: i32, %arg1: i32) -> (i32, i32, i32) {
    %c0_i32 = arith.constant 0 : i32
    %c0_i32_0 = arith.constant 0 : i32
    %c0_i32_1 = arith.constant 0 : i32
    return %arg0, %c0_i32, %c0_i32_0 : i32, i32, i32
  }
  func.func @transform_1(%arg0: i32, %arg1: i32) -> (i32, i32, i32) {
    %c0_i32 = arith.constant 0 : i32
    %c0_i32_0 = arith.constant 0 : i32
    %c0_i32_1 = arith.constant 0 : i32
    return %arg0, %c0_i32, %c0_i32_0 : i32, i32, i32
  }
  func.func @transform_2(%arg0: i32, %arg1: i32) -> (i32, i32) {
    %c0_i32 = arith.constant 0 : i32
    %c0_i32_0 = arith.constant 0 : i32
    %c0_i32_1 = arith.constant 0 : i32
    return %c0_i32, %c0_i32_0 : i32, i32
  }
  func.func @transform_3(%arg0: i32, %arg1: i32) -> (i32, i32, i32) {
    %c0_i32 = arith.constant 0 : i32
    %c0_i32_0 = arith.constant 0 : i32
    %c0_i32_1 = arith.constant 0 : i32
    return %arg1, %c0_i32, %c0_i32_0 : i32, i32, i32
  }
  func.func @transform_4(%arg0: i32, %arg1: i32) -> (i32, i32, i32) {
    %c0_i32 = arith.constant 0 : i32
    %c0_i32_0 = arith.constant 0 : i32
    %c0_i32_1 = arith.constant 0 : i32
    return %arg1, %c0_i32, %c0_i32_0 : i32, i32, i32
  }
  func.func @transform_5(%arg0: i32, %arg1: i32) -> (i32, i32, i32, i32) {
    %c0_i32 = arith.constant 0 : i32
    %c0_i32_0 = arith.constant 0 : i32
    %c0_i32_1 = arith.constant 0 : i32
    %c0_i32_2 = arith.constant 0 : i32
    return %arg1, %c0_i32, %c0_i32_0, %c0_i32_1 : i32, i32, i32, i32
  }
  func.func @transform_6(%arg0: i32, %arg1: i32) -> (i32, i32, i32) {
    %c0_i32 = arith.constant 0 : i32
    %c0_i32_0 = arith.constant 0 : i32
    %c0_i32_1 = arith.constant 0 : i32
    return %arg1, %c0_i32, %c0_i32_0 : i32, i32, i32
  }
  func.func @transform_7(%arg0: i32, %arg1: i32) -> (i32, i32, i32, i32) {
    %c0_i32 = arith.constant 0 : i32
    %c0_i32_0 = arith.constant 0 : i32
    %c0_i32_1 = arith.constant 0 : i32
    %c0_i32_2 = arith.constant 0 : i32
    return %arg1, %c0_i32, %c0_i32_0, %c0_i32_1 : i32, i32, i32, i32
  }
  func.func @transform_8(%arg0: i32, %arg1: i32) -> (i32, i32, i32) {
    %c0_i32 = arith.constant 0 : i32
    %c0_i32_0 = arith.constant 0 : i32
    %c0_i32_1 = arith.constant 0 : i32
    return %arg1, %c0_i32, %c0_i32_0 : i32, i32, i32
  }
  func.func @transform_9(%arg0: i32, %arg1: i32) -> (i32, i32, i32) {
    %c0_i32 = arith.constant 0 : i32
    %c0_i32_0 = arith.constant 0 : i32
    %c0_i32_1 = arith.constant 0 : i32
    return %arg1, %c0_i32, %c0_i32_0 : i32, i32, i32
  }
  func.func @transform_10(%arg0: i32, %arg1: i32) -> (i32, i32, i32) {
    %c0_i32 = arith.constant 0 : i32
    %c0_i32_0 = arith.constant 0 : i32
    %c0_i32_1 = arith.constant 0 : i32
    return %arg1, %c0_i32, %c0_i32_0 : i32, i32, i32
  }
  func.func @transform_11(%arg0: i32, %arg1: i32) -> (i32, i32, i32) {
    %c0_i32 = arith.constant 0 : i32
    %c0_i32_0 = arith.constant 0 : i32
    %c0_i32_1 = arith.constant 0 : i32
    return %arg1, %c0_i32, %c0_i32_0 : i32, i32, i32
  }
  func.func @transform_12(%arg0: i32, %arg1: i32) -> (i32, i32, i32) {
    %c0_i32 = arith.constant 0 : i32
    %c0_i32_0 = arith.constant 0 : i32
    %c0_i32_1 = arith.constant 0 : i32
    return %arg1, %c0_i32, %c0_i32_0 : i32, i32, i32
  }
  func.func @transform_13(%arg0: i32, %arg1: i32) -> (i32, i32, i32) {
    %c0_i32 = arith.constant 0 : i32
    %c0_i32_0 = arith.constant 0 : i32
    %c0_i32_1 = arith.constant 0 : i32
    return %arg1, %c0_i32, %c0_i32_0 : i32, i32, i32
  }
  func.func @transform_14(%arg0: i32, %arg1: i32) -> (i32, i32, i32) {
    %c0_i32 = arith.constant 0 : i32
    %c0_i32_0 = arith.constant 0 : i32
    %c0_i32_1 = arith.constant 0 : i32
    return %arg1, %c0_i32, %c0_i32_0 : i32, i32, i32
  }
  func.func @transform_15(%arg0: i32, %arg1: i32) -> (i32, i32, i32) {
    %c0_i32 = arith.constant 0 : i32
    %c0_i32_0 = arith.constant 0 : i32
    %c0_i32_1 = arith.constant 0 : i32
    return %arg1, %c0_i32, %c0_i32_0 : i32, i32, i32
  }
  func.func @transform_16(%arg0: i32, %arg1: i32) -> (i32, i32, i32) {
    %c0_i32 = arith.constant 0 : i32
    %c0_i32_0 = arith.constant 0 : i32
    %c0_i32_1 = arith.constant 0 : i32
    return %arg1, %c0_i32, %c0_i32_0 : i32, i32, i32
  }
  func.func @transform_17(%arg0: i32, %arg1: i32) -> (i32, i32, i32) {
    %c0_i32 = arith.constant 0 : i32
    %c0_i32_0 = arith.constant 0 : i32
    %c0_i32_1 = arith.constant 0 : i32
    return %arg1, %c0_i32, %c0_i32_0 : i32, i32, i32
  }
  func.func @transform_18(%arg0: i32, %arg1: i32) -> (i32, i32, i32) {
    %c0_i32 = arith.constant 0 : i32
    %c0_i32_0 = arith.constant 0 : i32
    %c0_i32_1 = arith.constant 0 : i32
    return %arg1, %c0_i32, %c0_i32_0 : i32, i32, i32
  }
  func.func @transform_19(%arg0: i32, %arg1: i32) -> (i32, i32, i32) {
    %c0_i32 = arith.constant 0 : i32
    %c0_i32_0 = arith.constant 0 : i32
    %c0_i32_1 = arith.constant 0 : i32
    return %arg1, %c0_i32, %c0_i32_0 : i32, i32, i32
  }
  func.func @transform_20(%arg0: i32, %arg1: i32) -> (i32, i32, i32) {
    %c0_i32 = arith.constant 0 : i32
    %c0_i32_0 = arith.constant 0 : i32
    %c0_i32_1 = arith.constant 0 : i32
    return %arg1, %c0_i32, %c0_i32_0 : i32, i32, i32
  }
  func.func @transform_21(%arg0: i32, %arg1: i32) -> (i32, i32, i32) {
    %c0_i32 = arith.constant 0 : i32
    %c0_i32_0 = arith.constant 0 : i32
    %c0_i32_1 = arith.constant 0 : i32
    return %arg0, %c0_i32, %c0_i32_0 : i32, i32, i32
  }
  func.func @transform_22(%arg0: i32, %arg1: i32) -> (i32, i32, i32, i32) {
    %c0_i32 = arith.constant 0 : i32
    %c0_i32_0 = arith.constant 0 : i32
    %c0_i32_1 = arith.constant 0 : i32
    %c0_i32_2 = arith.constant 0 : i32
    return %arg0, %c0_i32, %c0_i32_0, %c0_i32_1 : i32, i32, i32, i32
  }
}

</mosaic_0001>

<bundles_post_ra>
// kernel: tpu_custom_call.1
= control target key start
LH: loop header
LB: loop body
LE: loop exit
PB: predicated region body
PF: predicated region fallthrough
CT: control target
= control target key end

     0   :  { %s5419_s0 = inlined_call_operand.hbm [shape: f32[2,8,32], index: 0, kind: input, shape index: {}]   ;;  %s5420_s1 = inlined_call_operand.hbm [shape: f32[2,8,32], index: 1, kind: input, shape index: {}]   ;;  %s5421_s2 = inlined_call_operand.hbm [shape: f32[8,8], index: 2, kind: input, shape index: {}]   ;;  %s5422_s3 = inlined_call_operand.vmem [shape: f32[2,32,64], index: 3, kind: input, shape index: {}]   ;;  %s5423_s4 = inlined_call_operand.vmem [shape: f32[2,32,32], index: 4, kind: input, shape index: {}]   ;;  %s5424_s5 = inlined_call_operand.vmem [shape: f32[2,4,8,32], index: 5, kind: input, shape index: {}]   ;;  %s5425_s6 = inlined_call_operand.vmem [shape: f32[2,1,32], index: 6, kind: input, shape index: {}]   ;;  %s5426_s7 = inlined_call_operand.vmem [shape: f32[2,4,8,32], index: 7, kind: input, shape index: {}]   ;;  %s5427_s8 = inlined_call_operand.vmem [shape: f32[2,1,32], index: 8, kind: input, shape index: {}]   ;;  %s5428_s9 = inlined_call_operand.vmem [shape: f32[2,32,64], index: 9, kind: input, shape index: {}]   ;;  %s5429_s10 = inlined_call_operand.vmem [shape: f32[2,1,64], index: 10, kind: input, shape index: {}]   ;;  %s5430_s11 = inlined_call_operand.vmem [shape: f32[2,64,32], index: 11, kind: input, shape index: {}]   ;;  %s5431_s12 = inlined_call_operand.vmem [shape: f32[2,1,32], index: 12, kind: input, shape index: {}]   ;;  %s5432_s13 = inlined_call_operand.hbm [shape: f32[2,32,64], index: 13, kind: input, shape index: {}]   ;;  %s5433_s14 = inlined_call_operand.vmem [shape: f32[2,1,64], index: 14, kind: input, shape index: {}]   ;;  %s5434_s15 = inlined_call_operand.vmem [shape: f32[2,64,32], index: 15, kind: input, shape index: {}]   ;;  %s5435_s16 = inlined_call_operand.vmem [shape: f32[2,1,32], index: 16, kind: input, shape index: {}]   ;;  %s5436_s17 = inlined_call_operand.vmem [shape: f32[2,1,32], index: 17, kind: input, shape index: {}]   ;;  %s5437_s18 = inlined_call_operand.vmem [shape: f32[2,1,32], index: 18, kind: input, shape index: {}]   ;;  %s5438_s19 = inlined_call_operand.vmem [shape: f32[2,1,32], index: 19, kind: input, shape index: {}]   ;;  %s5439_s20 = inlined_call_operand.vmem [shape: f32[2,1,32], index: 20, kind: input, shape index: {}]   ;;  %s5440_s21 = inlined_call_operand.hbm [shape: f32[2,8,32], index: 21, kind: output, shape index: {0}]   ;;  %s5441_s22 = inlined_call_operand.hbm [shape: f32[2,4,8,8], index: 22, kind: output, shape index: {1}]  }
   0x1   :  { %5480 = sst [smem:[#allocation42_spill]] %s5419_s0 }
   0x2   :  { %5481 = sst [smem:[#allocation43_spill]] %s5420_s1 }
   0x3   :  { %5482 = sst [smem:[#allocation44_spill]] %s5421_s2 }
   0x4   :  { %5483 = sst [smem:[#allocation45_spill]] %s5422_s3 }
   0x5   :  { %5484 = sst [smem:[#allocation46_spill]] %s5423_s4 }
   0x6   :  { %5485 = sst [smem:[#allocation47_spill]] %s5424_s5 }
   0x7   :  { %5486 = sst [smem:[#allocation48_spill]] %s5425_s6 }
   0x8   :  { %5487 = sst [smem:[#allocation49_spill]] %s5426_s7 }
   0x9   :  { %5488 = sst [smem:[#allocation50_spill]] %s5427_s8 }
   0xa   :  { %5489 = sst [smem:[#allocation51_spill]] %s5428_s9 }
   0xb   :  { %5490 = sst [smem:[#allocation52_spill]] %s5429_s10 }
   0xc   :  { %5491 = sst [smem:[#allocation53_spill]] %s5430_s11 }
   0xd   :  { %5492 = sst [smem:[#allocation54_spill]] %s5431_s12 }
   0xe   :  { %5493 = sst [smem:[#allocation55_spill]] %s5432_s13 }
   0xf   :  { %5494 = sst [smem:[#allocation56_spill]] %s5433_s14 }
  0x10   :  { %5495 = sst [smem:[#allocation57_spill]] %s5434_s15 }
  0x11   :  { %5496 = sst [smem:[#allocation58_spill]] %s5435_s16 }
  0x12   :  { %5497 = sst [smem:[#allocation59_spill]] %s5436_s17 }
  0x13   :  { %5498 = sst [smem:[#allocation60_spill]] %s5437_s18 }
  0x14   :  { %5499 = sst [smem:[#allocation61_spill]] %s5438_s19 }
  0x15   :  { %5500 = sst [smem:[#allocation62_spill]] %s5439_s20 }
  0x16   :  { %5501 = sst [smem:[#allocation63_spill]] %s5440_s21 }
  0x17   :  { %5502 = sst [smem:[#allocation64_spill]] %s5441_s22 }
  0x18   :  { %28 = vsyncpa [#allocation5], 0 }
  0x19   :  { %30 = vsyncpa [#allocation5 + $0x1], 0 }
  0x1a   :  { %31 = vsyncpa [#allocation8], 0 }
  0x1b   :  { %33 = vsyncpa [#allocation8 + $0x1], 0 }
  0x1c   :  { %34 = vsyncpa [#allocation11], 0 }
  0x1d   :  { %36 = vsyncpa [#allocation11 + $0x1], 0 }
  0x1e   :  { %37 = vsyncpa [#allocation6], 0 }
  0x1f   :  { %39 = vsyncpa [#allocation6 + $0x1], 0 }
  0x20   :  { %40 = vsyncpa [#allocation14], 0 }
  0x21   :  { %42 = vsyncpa [#allocation14 + $0x1], 0  ;;  %s4639_s3 = smov 0   ;;  %s4641_s28 = smov 0  }
  0x22   :  { %s4643_s29 = smov 0   ;;  %s4645_s30 = smov 0  }
  0x23   :  { %s4647_s4 = smov 0   ;;  %s4649_s0 = smov 0  }
  0x24   :  { %s4651_s23 = smov 0   ;;  %s4653_s1 = smov 0  }
  0x25   :  { %s4655_s5 = smov 0   ;;  %s4657_s24 = smov 0  }
  0x26   :  { %s4659_s6 = smov 0  }
  0x27 LB: > { %5503 = sst [smem:[#allocation21_spill]] %s4466_s28  ;;  %s4693_s25 = sadd.s32 4294967295, %s4502_s6   ;;  %s4502_s6 = sphi %s4659_s6, %s48_s6   ;;  %s4498_s24 = sphi %s4657_s24, %s5608_s24   ;;  %s4494_s5 = sphi %s4655_s5, %s5607_s5   ;;  %s4490_s1 = sphi %s4653_s1, %s5606_s1   ;;  %s4486_s23 = sphi %s4651_s23, %s5605_s23   ;;  %s4482_s0 = sphi %s4649_s0, %s5604_s0   ;;  %s4478_s4 = sphi %s4647_s4, %s5603_s4   ;;  %s4474_s30 = sphi %s4645_s30, %s5602_s30   ;;  %s4470_s29 = sphi %s4643_s29, %s5601_s29   ;;  %s4466_s28 = sphi %s4641_s28, %s5600_s28   ;;  %s4462_s3 = sphi %s4639_s3, %s5599_s3  }
  0x28   : > { %5504 = sst [smem:[#allocation22_spill]] %s4470_s29  ;;  %s3648_s26 = sadd.s32 4294967294, %s4502_s6  }
  0x29   : > { %5505 = sst [smem:[#allocation23_spill]] %s4474_s30  ;;  %p80_p0 = scmp.ne.s32.totalorder %s4478_s4, %s4474_s30 }
  0x2a   : > { %5506 = sst [smem:[#allocation24_spill]] %s4478_s4  ;;  %p5450_p1 = scmp.eq.s32.totalorder %s4693_s25, 0 }
  0x2b   : > { %5507 = sst [smem:[#allocation25_spill]] %s4482_s0  ;;  %p413_p2 = scmp.ne.s32.totalorder %s4466_s28, %s4462_s3 }
  0x2c   : > { %5508 = sst [smem:[#allocation26_spill]] %s4486_s23  ;;  %p4703_p4 = por %p5450_p1, %p80_p0 }
  0x2d   : > { %5509 = sst [smem:[#allocation27_spill]] %s4490_s1  ;;  %p625_p5 = scmp.eq.s32.totalorder %s3648_s26, 3 }
  0x2e   : > { %5510 = sst [smem:[#allocation28_spill]] %s4494_s5  ;;  %p4709_p6 = por %p413_p2, %p5450_p1 }
  0x2f   : > { %5511 = sst [smem:[#allocation29_spill]] %s4498_s24  ;;  %p3649_p7 = scmp.ge.s32.totalorder %s4502_s6, 1 }
  0x30   : > { %5512 = sst [smem:[#allocation30_spill]] %s4502_s6  ;;  %p4714_p8 = por %p625_p5, %p80_p0 }
  0x31   : > { %s5513_s2 = scalar_select %p4703_p4, 1, 0 }
  0x32   : > { %s5514_s27 = scalar_select %p4709_p6, 1, 0 }
  0x33   : > { %s5516_s22 = scalar_select %p4714_p8, 1, 0 }
  0x34   : > { %5515 = sst [smem:[#allocation31_spill]] %s5514_s27  ;;  %p658_p9 = scmp.lt.s32.totalorder %s4502_s6, 5 }
  0x35   : > { %5517 = sst [smem:[#allocation32_spill]] %s5516_s22  ;;  %s4504_s30 = smov [#allocation9]  }
  0x36   : > { %p4719_p10 = pnand %p3649_p7, %p658_p9  ;;  %s671_s21 = sshll.u32 %s4504_s30, 4  ;;  %s672_s21 = int_to_ptr.vmem [resolvable:$true] %s671_s21 }
  0x37   : > { %s5520_s19 = sld [smem:[#allocation44_spill]] }
  0x38   : > { %s5518_s3 = scalar_select %p4719_p10, 1, 0 }
  0x39   : > { %p4066_p11 = pneg %p4719_p10 }
  0x3b   : > { %p4727_p12 = pnand %p4066_p11, %p5450_p1 }
  0x3d   : > { %s4218_s18 = scalar_lea.hbm %s5520_s19, 128  ;;  %p4220_p0 = pneg %p4727_p12 }
  0x3e   : > { %p4219_p13 = scmp.ne.s32.totalorder %s5520_s19, %s4218_s18  ;;  %p4225_p7 = scmp.lt.u32.totalorder %s4218_s18, %s5520_s19 }
  0x40   : > { %p4221_p2 = pnand %p4220_p0, %p4219_p13 }
  0x42   : > { %p4222_p5 = pneg %p4221_p2 }
  0x44   : > { %p4227_p9 = pnand %p4225_p7, %p4222_p5 }
  0x46   : > { %4230 = shalt.err (!%p4227_p9)
}
  0x47   : > { %s4231_s14 = scalar_lea.vmem %s672_s21, 128  ;;  %p4239_p8 = scmp.lt.s32.totalorder %s672_s21, %s672_s21 }
  0x48   : > { %p4232_p11 = scmp.ne.s32.totalorder %s672_s21, %s4231_s14  ;;  %p4240_p6 = scmp.lt.s32.totalorder %s4231_s14, %s4231_s14 }
  0x4a   : > { %p4234_p1 = pnand %p4232_p11, %p4220_p0  ;;  %p4241_p4 = por %p4240_p6, %p4239_p8 }
  0x4c   : > { %p4235_p3 = pneg %p4234_p1 }
  0x4e   : > { %p4242_p10 = pnand %p4241_p4, %p4235_p3 }
  0x50   : > { %4245 = shalt.err (!%p4242_p10)
}
  0x51   : > { %4069 = dma.hbm_to_vmem [thread:$0]  (!%p4727_p12), %s5520_s19, 128, %s672_s21, [#allocation8]  }
  0x52   : > { %p74_p1 = scmp.ne.s32.totalorder %s4482_s0, %s4478_s4  ;;  %p75_p3 = scmp.eq.s32.totalorder %s4502_s6, 0 }
  0x53   : > { %p407_p4 = scmp.ne.s32.totalorder %s4470_s29, %s4466_s28  ;;  %p5521_p6 = scmp.eq.s32.totalorder %s4693_s25, 3 }
  0x54   : > { %p5460_p10 = scmp.lt.s32.totalorder %s4502_s6, 4  ;;  %p76_p13 = por %p75_p3, %p74_p1 }
  0x55   : > { %p4756_p8 = por %p5521_p6, %p74_p1  ;;  %p4761_p0 = por %p407_p4, %p75_p3 }
  0x56   : > { %s682_s20 = sand.u32 1, %s4482_s0   ;;  %s3653_s22 = sshll.u32 %s4498_s24, 7 }
  0x57   : > { %s5522_s15 = scalar_select %p4756_p8, 1, 0 }
  0x58   : > { %s4767_s26 = sshll.u32 %s682_s20, 3  ;;  %s5525_s16 = sld [smem:[#allocation42_spill]] }
  0x59   : > { %5523 = sst [smem:[#allocation33_spill]] %s5522_s15  ;;  %s686_s14 = scalar_lea.vmem [#allocation4], %s4767_s26 }
  0x5a   : > { %s693_s1 = sshll.u32 %s686_s14, 4  ;;  %p4777_p12 = pnand %p5460_p10, %p76_p13  ;;  %s4781_s1 = int_to_ptr.vmem [resolvable:$true] %s693_s1 }
  0x5b   : > { %s5527_s30 = sld [smem:[#allocation43_spill]]  ;;  %s683_s10 = scalar_lea.sflag [#allocation5], %s682_s20 }
  0x5c   : > { %p4248_p5 = pneg %p4777_p12 }
  0x5e   : > { %s4772_s17 = scalar_lea.hbm %s5525_s16, %s3653_s22  ;;  %s4251_s7 = scalar_lea.hbm %s5525_s16, 256 }
  0x5f   : > { %s4246_s9 = scalar_lea.hbm %s4772_s17, 128  ;;  %p4252_p11 = scmp.lt.u32.totalorder %s4772_s17, %s5525_s16 }
  0x60   : > { %p4247_p2 = scmp.ne.s32.totalorder %s4772_s17, %s4246_s9  ;;  %p4253_p1 = scmp.lt.u32.totalorder %s4251_s7, %s4246_s9 }
  0x61   : > { %s5528_s12 = smov %s5527_s30  ;;  %s4786_s11 = scalar_lea.hbm %s5527_s30, %s3653_s22 }
  0x62   : > { %p4249_p7 = pnand %p4248_p5, %p4247_p2  ;;  %p4254_p3 = por %p4253_p1, %p4252_p11 }
  0x63   : > { %p4255_p4 = scmp.lt.u32.totalorder %s4246_s9, %s4772_s17 }
  0x64   : > { %p4250_p9 = pneg %p4249_p7 }
  0x65   : > { %p4256_p6 = por %p4255_p4, %p4254_p3 }
  0x67   : > { %p4257_p13 = pnand %p4256_p6, %p4250_p9 }
  0x69   : > { %4260 = shalt.err (!%p4257_p13)
}
  0x6a   : > { %s4261_s15 = scalar_lea.vmem %s4781_s1, 128  ;;  %s4505_s8 = smov [#allocation4]  }
  0x6b   : > { %p4262_p2 = scmp.ne.s32.totalorder %s4781_s1, %s4261_s15  ;;  %s4266_s20 = sshll.u32 %s4505_s8, 4  ;;  %s4267_s20 = int_to_ptr.vmem [resolvable:$false] %s4266_s20 }
  0x6c   : > { %s4268_s23 = scalar_lea.vmem %s4267_s20, 256  ;;  %p4269_p8 = scmp.lt.s32.totalorder %s4781_s1, %s4267_s20 }
  0x6d   : > { %p4264_p7 = pnand %p4262_p2, %p4248_p5  ;;  %p4270_p11 = scmp.lt.s32.totalorder %s4268_s23, %s4261_s15 }
  0x6f   : > { %p4265_p10 = pneg %p4264_p7  ;;  %p4271_p1 = por %p4270_p11, %p4269_p8 }
  0x71   : > { %p4272_p3 = pnand %p4271_p1, %p4265_p10 }
  0x73   : > { %4275 = shalt.err (!%p4272_p3)
}
  0x74   : > { %4073 = dma.hbm_to_vmem [thread:$0]  (!%p4777_p12), %s4772_s17, 128, %s4781_s1, %s683_s10  }
  0x75   : > { %p5529_p9 = scmp.lt.s32.totalorder %s4502_s6, 4  ;;  %s700_s9 = sand.u32 1, %s4502_s6  }
  0x76   : > { %s704_s27 = scalar_lea.vmem [#allocation7], %s4767_s26  ;;  %s701_s21 = scalar_lea.sflag [#allocation8], %s700_s9 }
  0x77   : > { %p4817_p4 = pnand %p5529_p9, %p4761_p0  ;;  %s711_s22 = sshll.u32 %s704_s27, 4  ;;  %s712_s22 = int_to_ptr.vmem [resolvable:$true] %s711_s22 }
  0x78   : > { %s4276_s30 = scalar_lea.hbm %s4786_s11, 128  ;;  %s4281_s10 = scalar_lea.hbm %s5528_s12, 256 }
  0x79   : > { %s5530_s7 = scalar_select %p4817_p4, 1, 0 }
  0x7a   : > { %p4277_p8 = scmp.ne.s32.totalorder %s4786_s11, %s4276_s30  ;;  %p4282_p0 = scmp.lt.u32.totalorder %s4786_s11, %s5528_s12 }
  0x7b   : > { %p4283_p13 = scmp.lt.u32.totalorder %s4281_s10, %s4276_s30  ;;  %p4285_p7 = scmp.lt.u32.totalorder %s4276_s30, %s4786_s11 }
  0x7c   : > { %p4279_p10 = pnand %p4277_p8, %p4248_p5 }
  0x7d   : > { %p4284_p2 = por %p4283_p13, %p4282_p0 }
  0x7e   : > { %p4280_p6 = pneg %p4279_p10 }
  0x7f   : > { %p4286_p11 = por %p4285_p7, %p4284_p2 }
  0x81   : > { %p4287_p1 = pnand %p4286_p11, %p4280_p6 }
  0x83   : > { %4290 = shalt.err (!%p4287_p1)
}
  0x84   : > { %s4291_s26 = scalar_lea.vmem %s712_s22, 128  ;;  %s4506_s17 = smov [#allocation7]  }
  0x85   : > { %p4292_p3 = scmp.ne.s32.totalorder %s712_s22, %s4291_s26  ;;  %s4296_s8 = sshll.u32 %s4506_s17, 4  ;;  %s4297_s8 = int_to_ptr.vmem [resolvable:$false] %s4296_s8 }
  0x86   : > { %s4298_s20 = scalar_lea.vmem %s4297_s8, 256  ;;  %p4299_p10 = scmp.lt.s32.totalorder %s712_s22, %s4297_s8 }
  0x87   : > { %p4294_p9 = pnand %p4292_p3, %p4248_p5  ;;  %p4300_p4 = scmp.lt.s32.totalorder %s4298_s20, %s4291_s26 }
  0x89   : > { %p4295_p8 = pneg %p4294_p9  ;;  %p4301_p0 = por %p4300_p4, %p4299_p10 }
  0x8b   : > { %p4302_p13 = pnand %p4301_p0, %p4295_p8 }
  0x8d   : > { %4305 = shalt.err (!%p4302_p13)
}
  0x8e   : > { %4076 = dma.hbm_to_vmem [thread:$0]  (!%p4777_p12), %s4786_s11, 128, %s712_s22, %s701_s21  }
  0x8f   : > { %s400_s23 = sadd.s32 1, %s4470_s29  ;;  %s790_s9 = sand.u32 1, %s4470_s29  }
  0x90   : > { %s57_s27 = sadd.s32 1, %s4494_s5  ;;  %s3656_s30 = sshll.u32 %s790_s9, 5 }
  0x91   : > { %p58_p5 = scmp.ge.s32.totalorder %s57_s27, 2  ;;  %s3735_s14 = sshll.u32 %s4494_s5, 9 }
  0x92   : > { %s5532_s19 = sadd.s32 1, %s4498_s24  ;;  %s5533_s13 = sld [smem:[#allocation55_spill]] }
  0x93   : > { %s5610_s27 = smov (%p58_p5, %s57_s27), 0  ;;  %s5612_s19 = smov (!%p58_p5, %s5532_s19), %s4498_s24 }
  0x94   : > { %5531 = sst [smem:[#allocation34_spill]] %s5610_s27  ;;  %s397_s15 = ssub.s32 %s4494_s5, %s5610_s27 }
  0x95   : > { %p62_p12 = scmp.ge.s32.totalorder %s5612_s19, 2  ;;  %p398_p4 = scmp.eq.s32.totalorder %s397_s15, 0 }
  0x96   : > { %s794_s22 = scalar_lea.vmem [#allocation10], %s3656_s30  ;;  %s4871_s8 = scalar_lea.sflag [#allocation11], %s790_s9 }
  0x97   : > { %s801_s21 = sshll.u32 %s794_s22, 4  ;;  %s5614_s19 = smov (%p62_p12, %s5612_s19), 0  ;;  %s4865_s21 = int_to_ptr.vmem [resolvable:$true] %s801_s21 }
  0x98   : > { %s4856_s11 = scalar_lea.hbm %s5533_s13, %s3735_s14  ;;  %5534 = sst [smem:[#allocation35_spill]] %s5614_s19 }
  0x99   : > { %s4861_s18 = scalar_select %p398_p4, %s4470_s29, %s400_s23  }
  0x9a   : > { %s64_s26 = ssub.s32 %s4498_s24, %s5614_s19  ;;  %s4306_s20 = scalar_lea.hbm %s4856_s11, 512 }
  0x9b   : > { %5535 = sst [smem:[#allocation36_spill]] %s4861_s18  ;;  %p4867_p6 = scmp.eq.s32.totalorder %s64_s26, 0 }
  0x9c   : > { %p4307_p2 = scmp.ne.s32.totalorder %s4856_s11, %s4306_s20  ;;  %p5537_p7 = scmp.ne.s32.totalorder %s5530_s7, 0 }
  0x9d   : > { %s4311_s14 = scalar_lea.hbm %s5533_s13, 1024  ;;  %p4312_p9 = scmp.lt.u32.totalorder %s4856_s11, %s5533_s13 }
  0x9e   : > { %p4308_p11 = pneg %p5537_p7  ;;  %p4313_p8 = scmp.lt.u32.totalorder %s4311_s14, %s4306_s20 }
  0x9f   : > { %p4315_p0 = scmp.lt.u32.totalorder %s4306_s20, %s4856_s11 }
  0xa0   : > { %p4309_p1 = pnand %p4308_p11, %p4307_p2  ;;  %p4314_p10 = por %p4313_p8, %p4312_p9 }
  0xa2   : > { %p4310_p3 = pneg %p4309_p1  ;;  %p4316_p13 = por %p4315_p0, %p4314_p10 }
  0xa4   : > { %p4317_p5 = pnand %p4316_p13, %p4310_p3 }
  0xa6   : > { %4320 = shalt.err (!%p4317_p5)
}
  0xa7   : > { %s4321_s9 = scalar_lea.vmem %s4865_s21, 512  ;;  %s4507_s1 = smov [#allocation10]  }
  0xa8   : > { %p4322_p12 = scmp.ne.s32.totalorder %s4865_s21, %s4321_s9  ;;  %s4326_s22 = sshll.u32 %s4507_s1, 4  ;;  %s4327_s22 = int_to_ptr.vmem [resolvable:$false] %s4326_s22 }
  0xa9   : > { %s4328_s26 = scalar_lea.vmem %s4327_s22, 1024  ;;  %p4329_p1 = scmp.lt.s32.totalorder %s4865_s21, %s4327_s22 }
  0xaa   : > { %p4324_p4 = pnand %p4322_p12, %p4308_p11  ;;  %p4330_p9 = scmp.lt.s32.totalorder %s4328_s26, %s4321_s9 }
  0xac   : > { %p4325_p2 = pneg %p4324_p4  ;;  %p4331_p8 = por %p4330_p9, %p4329_p1 }
  0xae   : > { %p4332_p10 = pnand %p4331_p8, %p4325_p2 }
  0xb0   : > { %4335 = shalt.err (!%p4332_p10)
}
  0xb1   : > { %s4508_s20 = smov 128   ;;  %s4509_s30 = smov 8  }
  0xb2   : > { %4079 = dma.hbm_to_vmem [thread:$0]  (!%p5537_p7), %s4856_s11, 512, %s4865_s21, %s4871_s8, %s4508_s20, %s4508_s20, %s4509_s30  }
  0xb3   : > { %s5538_s23 = sadd.s32 1, %s4482_s0  ;;  %p5540_p11 = scmp.ne.s32.totalorder %s5518_s3, 0 }
  0xb4   : > { %s4904_s14 = scalar_select %p4867_p6, %s4482_s0, %s5538_s23  }
  0xb5   : > { %857 = sbr.rel (%p5540_p11) target bundleno = 4682 (0x124a), region = 104 }
  0xb6   : > { %5539 = sst [smem:[#allocation37_spill]] %s4904_s14 }
  0xbc   : > { %s4909_s15 = sand.u32 1, %s4478_s4   ;;  %p5542_p3 = scmp.ne.s32.totalorder %s5513_s2, 0 }
  0xbd   : > { %5541 = sst [smem:[#allocation38_spill]] %s4909_s15  ;;  %s4912_s10 = sshll.u32 %s4909_s15, 3 }
  0xbe   : > { %s860_s9 = scalar_lea.sflag [#allocation5], %s4909_s15 }
  0xbf   : > { %4437 = dma.done.wait (%p5542_p3), %s860_s9, 128  }
  0xc0   : > { %4439 = vsyncadd (%p5542_p3), %s860_s9, 4294967168  ;;  %s868_s3 = sand.u32 1, %s4693_s25  }
  0xc1   : > { %s869_s7 = scalar_lea.sflag [#allocation8], %s868_s3 }
  0xc2   : > { %4441 = dma.done.wait (%p5542_p3), %s869_s7, 128  }
  0xc3   : > { %4443 = vsyncadd (%p5542_p3), %s869_s7, 4294967168  ;;  %p5543_p6 = scmp.eq.s32.totalorder %s4693_s25, 0 }
  0xc5   : > { %4445 = dma.done.wait (%p5543_p6), [#allocation8], 128   ;;  %p5544_p7 = pmov %p5543_p6 }
  0xc6   : > { %s5545_s21 = sld [smem:[#allocation31_spill]]  ;;  %s881_s17 = sand.u32 1, %s4466_s28  }
  0xc7   : > { %4447 = vsyncadd (%p5544_p7), [#allocation8], 4294967168  ;;  %s3663_s8 = sshll.u32 %s881_s17, 5  ;;  %s882_s22 = scalar_lea.sflag [#allocation11], %s881_s17 }
  0xc8   : > { %s4931_s26 = scalar_lea.vmem [#allocation10], %s3663_s8 }
  0xc9   : > { %5546 = sst [smem:[#allocation39_spill]] %s4931_s26 }
  0xcc   : > { %p5547_p0 = scmp.ne.s32.totalorder %s5545_s21, 0 }
  0xce   : > { %4449 = dma.done.wait (%p5547_p0), %s882_s22, 512  }
  0xcf   : > { %4451 = vsyncadd (%p5547_p0), %s882_s22, 4294966784  ;;  %s5548_s2 = sld [smem:[#allocation26_spill]]  ;;  %s3665_s20 = sshll.u32 %s4909_s15, 5 }
  0xd0   : > { %s5550_s8 = sld [smem:[#allocation45_spill]]  ;;  %s5551_s12 = sld [smem:[#allocation46_spill]] }
  0xd1   : > { %s5552_s27 = sld [smem:[#allocation47_spill]]  ;;  %s5553_s3 = sld [smem:[#allocation49_spill]] }
  0xd2   : > { %s5555_s11 = sld [smem:[#allocation51_spill]]  ;;  %s5557_s28 = sld [smem:[#allocation53_spill]] }
  0xd3   : > { %s5563_s16 = sld [smem:[#allocation58_spill]]  ;;  %s5564_s18 = sld [smem:[#allocation59_spill]] }
  0xd4   : > { %s5565_s6 = sld [smem:[#allocation60_spill]]  ;;  %s5566_s5 = sld [smem:[#allocation61_spill]] }
  0xd5   : > { %p1026_p13 = scmp.lt.s32.totalorder %s5548_s2, 1  ;;  %p3680_p5 = scmp.ne.s32.totalorder %s5548_s2, 0 }
  0xd6   : > { %s5568_s4 = scalar_lea.vmem (!%p3680_p5), [#allocation4], %s4912_s10  ;;  %vm1096_vm0 = vcmask (!%p3680_p5), 261120  }
  0xd7   : > { %s4940_s30 = scalar_select %p1026_p13, %s5548_s2, 1 }
  0xd8   : > { %v1095_v0 = vld [vmem:[%s5568_s4] sm:$0xff] (!%p3680_p5) }
  0xd9   : > { %s3736_s25 = sshll.u32 %s4940_s30, 5  ;;  %s1078_s19 = scalar_lea.vmem %s5563_s16, %s4940_s30  ;;  %1097 = vst.msk [vmem:[#allocation2] sm:$0xff] (!%p3680_p5), %vm1096_vm0, %v1095_v0 }
  0xda   : > { %s4950_s22 = scalar_lea.vmem %s5550_s8, %s3736_s25  ;;  %s4955_s13 = scalar_lea.vmem %s5551_s12, %s3736_s25 }
  0xdb   : > { %s4960_s24 = scalar_lea.vmem %s5552_s27, %s3736_s25  ;;  %s4965_s7 = scalar_lea.vmem %s5553_s3, %s3736_s25 }
  0xdc   : > { %s4974_s12 = scalar_lea.vmem %s5555_s11, %s3736_s25  ;;  %s3741_s27 = sshll.u32 %s4940_s30, 6 }
  0xdd   : > { %s4984_s23 = scalar_lea.vmem %s5557_s28, %s3741_s27  ;;  %s5561_s11 = sld [smem:[#allocation57_spill]] }
  0xde   : > { %5558 = sst [smem:[#allocation40_spill]] %s4984_s23  ;;  %s1081_s26 = scalar_lea.vmem %s5564_s18, %s4940_s30 }
  0xdf   : > { %s1084_s3 = scalar_lea.vmem %s5565_s6, %s4940_s30  ;;  %s1087_s8 = scalar_lea.vmem %s5566_s5, %s4940_s30 }
  0xe0   : > { %s5569_s23 = scalar_lea.vmem (!%p3680_p5), [#allocation7], %s4912_s10 }
  0xe1   : > { %v1098_v1 = vld [vmem:[%s5569_s23] sm:$0xff] (!%p3680_p5) }
  0xe2   : > { %1099 = vst.msk [vmem:[#allocation3] sm:$0xff] (!%p3680_p5), %vm1096_vm0, %v1098_v1 }
  0xe3   : > { %s4997_s15 = scalar_lea.vmem %s5561_s11, %s3741_s27  ;;  %s5567_s27 = sld [smem:[#allocation62_spill]] }
  0xe4   : > { %5562 = sst [smem:[#allocation41_spill]] %s4997_s15  ;;  %s1018_s11 = scalar_lea.vmem [#allocation12], %s4912_s10 }
  0xe5   : > { %s5020_s15 = scalar_lea.vmem [#allocation13], %s3665_s20  ;;  %1094 = sbr.rel (%p3680_p5) target bundleno = 236 (0xec), region = 124 }
  0xe9   : > { %s1090_s1 = scalar_lea.vmem %s5567_s27, %s4940_s30 }
  0xec PF: > { %v1103_v2 = vld [vmem:[%s4950_s22] sm:$0xff]  ;;  %v1104_v3 = vld [vmem:[%s4950_s22 + $0x8] sm:$0xff]  ;;  %v1105_v4 = vld [vmem:[%s4950_s22 + $0x10] sm:$0xff]  ;;  %v4510_v5 = vmov 0.0|0.0   ;;  %vm4511_vm1 = vmmov 0   ;;  %v4512_v8 = vmov 0.0  }
  0xed   : > { %4004 = vmatprep.subr.bf16.mxu1 %v4510_v5  ;;  %v4005_v6 = vpack.c.bf16 %v1104_v3, %v1103_v2  ;;  %v1106_v7 = vld [vmem:[%s4950_s22 + $0x18] sm:$0xff]  ;;  %3830 = vmatprep.mubr.msk.f32.mxu1 %vm4511_vm1, %v4512_v8  ;;  %v1181_v10 = vld [vmem:[%s4955_s13] sm:$0xff]  ;;  %v1182_v11 = vld [vmem:[%s4955_s13 + $0x8] sm:$0xff]  ;;  %vm1107_vm2 = vcmask 261120   ;;  %s4514_s2 = smov 96   ;;  %vm1262_vm3 = vcmask 64512  }
  0xee   : > { %3844 = vmatprep.subr.mxu0 %v4512_v8  ;;  %3846 = vmatprep.mubr.msk.f32.mxu0 %vm4511_vm1, %v4512_v8  ;;  %v4008_v9 = vpack.c.bf16 %v1106_v7, %v1105_v4  ;;  %v5040_v12 = vld [vmem:[#allocation2] sm:$0xff]  ;;  %v4011_v13 = vpack.c.bf16 %v1182_v11, %v1181_v10  ;;  %v1183_v14 = vld [vmem:[%s4955_s13 + $0x10] sm:$0xff]  ;;  %v1184_v15 = vld [vmem:[%s4955_s13 + $0x18] sm:$0xff]  ;;  %s4513_s13 = smov 88   ;;  %s4515_s20 = smov 120   ;;  %vm2952_vm4 = vcmask 523264  }
  0xef   : > { %4006 = vmatpush3.bf16.msra.mxu1 %v4005_v6  ;;  %v4014_v16 = vpack.c.bf16 %v1184_v15, %v1183_v14  ;;  %v5051_v17 = vld [vmem:[#allocation3] sm:$0xff]  ;;  %v5072_v22 = vld [vmem:[#allocation9] sm:$0xff]  ;;  %s4516_s22 = smov 80   ;;  %s4517_s21 = smov 112   ;;  %v1492_v59 = vld [vmem:[%s4960_s24] sm:$0xff] }
  0xf0   : > { %4007 = vmatprep.subr.bf16.mxu1 %v4510_v5  ;;  %v3691_v56 = vld [vmem:[%s4960_s24 + $0x8] sm:$0xff]  ;;  %v1493_v60 = vld [vmem:[%s4965_s7] sm:$0xff]  ;;  %s4518_s14 = smov 72   ;;  %s4519_s0 = smov 104  }
  0xf1   : > { %v3693_v57 = vld [vmem:[%s4965_s7 + $0x8] sm:$0xff]  ;;  %s5570_s16 = sld [smem:[#allocation48_spill]]  ;;  %s5572_s9 = sld [smem:[#allocation50_spill]] }
  0xf2   : > { %s5574_s17 = sld [smem:[#allocation40_spill]]  ;;  %s5575_s5 = sld [smem:[#allocation39_spill]] }
  0xf3   : > { %4009 = vmatpush3.bf16.msra.mxu1 %v4008_v9  ;;  %s5577_s4 = sld [smem:[#allocation41_spill]] }
  0xf4   : > { %4010 = vmatprep.subr.bf16.mxu1 %v4510_v5 }
  0xf6   : > { %3831 = vmatmul.mubr.msk.f32.vlgmr.msra.gmra.mrb[0].mxu1 %vm1107_vm2, %v5040_v12 }
  0xf7   : > { %4012 = vmatpush3.bf16.msra.mxu1 %v4011_v13  ;;  %3841 = vmatprep.mubr.msk.f32.mxu1 %vm4511_vm1, %v4512_v8  ;;  %s5571_s29 = scalar_lea.vmem %s5570_s16, %s4940_s30  ;;  %s5573_s6 = scalar_lea.vmem %s5572_s9, %s4940_s30 }
  0xf8   : > { %4013 = vmatprep.subr.bf16.mxu1 %v4510_v5 }
  0xfb   : > { %4015 = vmatpush3.bf16.msra.mxu1 %v4014_v16 }
  0xfc   : > { %3849 = vmatprep.subr.mxu1 %v4512_v8 }
  0xfe   : > { %3842 = vmatmul.mubr.msk.f32.vlgmr.msra.gmra.mrb[2].mxu1 %vm1107_vm2, %v5051_v17 }
  0xff   : > { %3851 = vmatprep.mubr.msk.f32.mxu1 %vm4511_vm1, %v4512_v8 }
 0x1c9   : > { %v5057_v18 = vpop.f32.mrb[0].mxu1 }
 0x1ca   : > { %v5060_v19 = vmul.f32 0.35355338, %v5057_v18  ;;  %1496 = vrot.lane.b32.xlu1 %v5057_v18, %s4513_s13  ;;  %1260 = vrot.lane.b32.xlu0 %v5057_v18, %s4514_s2  ;;  %v3832_v20 = vpop.f32.mrb[1].mxu1 }
 0x1cc   : > { %3850 = vmatpush3.msra.mxu1 %v5060_v19 }
 0x1cd   : > { %3859 = vmatprep.subr.mxu1 %v4512_v8 }
 0x1d1   : > { %v5079_v32 = vpop.f32.mrb[2].mxu1 }
 0x1d2   : > { %v3843_v33 = vpop.f32.mrb[3].mxu1 }
 0x1d3   : > { %v3701_v33 = vld [vmem:[%s4960_s24 + $0x10] sm:$0xff] }
 0x23c   : > { %v1261_v21 = vpop.permute.xlu0 %1260  ;;  %v1497_v34 = vpop.permute.xlu1 %1496 }
 0x23d   : > { %3845 = vmatpush3.xpose.msk.msra.mxu0 %vm1262_vm3, %v1261_v21 }
 0x23e   : > { %3854 = vmatprep.subr.mxu0 %v4512_v8 }
 0x240   : > { %3847 = vmatmul.mubr.msk.f32.vlgmr.msra.gmra.mrb[0].mxu0 %vm1262_vm3, %v5060_v19 }
 0x241   : > { %3856 = vmatprep.mubr.msk.f32.mxu0 %vm4511_vm1, %v4512_v8  ;;  %3855 = vmatpush3.msra.mxu0 %v5079_v32 }
 0x242   : > { %3864 = vmatprep.subr.mxu0 %v4512_v8 }
 0x313   : > { %v1334_v23 = vpop.f32.mrb[0].mxu0 }
 0x314   : > { %v1335_v24 = vadd.f32 %v1334_v23, %v5072_v22  ;;  %v3848_v25 = vpop.f32.mrb[1].mxu0 }
 0x316   : > { %v1338_v26 = vsel %vm1262_vm3, %v1335_v24, -inf }
 0x317   : > { %1339 = vmax.xlane.f32.xlu0 %v1338_v26 }
 0x3a4   : > { %v1340_v27 = vpop.xlane.xlu0 %1339 }
 0x3a5   : > { %v1341_v28 = vsub.f32 %v1335_v24, %v1340_v27 }
 0x3a7   : > { %v1342_v29 = vmul.f32 1.442695, %v1341_v28 }
 0x3a9   : > { %4194 = vpow2.f32 %v1342_v29 }
 0x3b3   : > { %v4195_v30 = vpop.eup %4194 }
 0x3b4   : > { %v1344_v31 = vsel %vm1262_vm3, %v4195_v30, 0.0 }
 0x3b5   : > { %1345 = vadd.xlane.f32.xlu1 %v1344_v31 }
 0x3c6   : > { %1494 = vrot.lane.b32.xlu1 %v5060_v19, %s4515_s20 }
 0x442   : > { %v1346_v35 = vpop.xlane.xlu1 %1345 }
 0x443   : > { %4196 = vrcp.f32 %v1346_v35 }
 0x446   : > { %v1495_v38 = vpop.permute.xlu1 %1494 }
 0x44d   : > { %v4197_v36 = vpop.eup %4196 }
 0x44e   : > { %v5083_v37 = vmul.f32 %v4197_v36, %v4195_v30 }
 0x450   : > { %3852 = vmatmul.mubr.msk.f32.vlgmr.msra.gmra.mrb[4].mxu1 %vm1262_vm3, %v5083_v37  ;;  %3857 = vmatmul.mubr.msk.f32.vlgmr.msra.gmra.mrb[2].mxu0 %vm1262_vm3, %v5083_v37 }
 0x451   : > { %3860 = vmatpush3.xpose.msk.msra.mxu1 %vm1262_vm3, %v1497_v34  ;;  %3865 = vmatpush3.msra.mxu0 %v1495_v38  ;;  %v3703_v34 = vld [vmem:[%s4965_s7 + $0x10] sm:$0xff] }
 0x452   : > { %3861 = vmatprep.mubr.msk.f32.mxu1 %vm4511_vm1, %v4512_v8  ;;  %3869 = vmatprep.subr.mxu1 %v4512_v8 }
 0x453   : > { %3866 = vmatprep.mubr.msk.f32.mxu0 %vm4511_vm1, %v4512_v8  ;;  %3874 = vmatprep.subr.mxu0 %v4512_v8 }
 0x454   : > { %3862 = vmatmul.mubr.msk.f32.vlgmr.msra.gmra.mrb[6].mxu1 %vm1262_vm3, %v1495_v38 }
 0x455   : > { %3871 = vmatprep.mubr.msk.f32.mxu1 %vm4511_vm1, %v4512_v8 }
 0x523   : > { %v1418_v39 = vpop.f32.mrb[4].mxu1  ;;  %v1488_v40 = vpop.f32.mrb[2].mxu0 }
 0x524   : > { %v3853_v41 = vpop.f32.mrb[5].mxu1  ;;  %v3858_v42 = vpop.f32.mrb[3].mxu0 }
 0x527   : > { %v1568_v43 = vpop.f32.mrb[6].mxu1 }
 0x528   : > { %v1569_v44 = vadd.f32 %v1568_v43, %v5072_v22  ;;  %v3863_v45 = vpop.f32.mrb[7].mxu1 }
 0x52a   : > { %v1572_v46 = vsel %vm1262_vm3, %v1569_v44, -inf }
 0x52b   : > { %1573 = vmax.xlane.f32.xlu1 %v1572_v46 }
 0x53c   : > { %1658 = vrot.lane.b32.xlu1 %v5079_v32, %s4515_s20  ;;  %s5579_s20 = sld [smem:[#allocation52_spill]] }
 0x5b8   : > { %v1574_v47 = vpop.xlane.xlu1 %1573 }
 0x5b9   : > { %v1575_v48 = vsub.f32 %v1569_v44, %v1574_v47 }
 0x5bb   : > { %v1576_v49 = vmul.f32 1.442695, %v1575_v48 }
 0x5bc   : > { %v1659_v50 = vpop.permute.xlu1 %1658 }
 0x5bd   : > { %4198 = vpow2.f32 %v1576_v49  ;;  %3870 = vmatpush3.msra.mxu1 %v1659_v50 }
 0x5be   : > { %3879 = vmatprep.subr.mxu1 %v4512_v8 }
 0x5c7   : > { %v4199_v51 = vpop.eup %4198 }
 0x5c8   : > { %v1578_v52 = vsel %vm1262_vm3, %v4199_v51, 0.0 }
 0x5c9   : > { %1579 = vadd.xlane.f32.xlu0 %v1578_v52 }
 0x5df   : > { %2029 = vrot.lane.b32.xlu0 %v5057_v18, %s4516_s22  ;;  %s5580_s22 = scalar_lea.vmem %s5579_s20, %s4940_s30 }
 0x5e3   : > { %2027 = vrot.lane.b32.xlu0 %v5060_v19, %s4517_s21 }
 0x656   : > { %v1580_v53 = vpop.xlane.xlu0 %1579 }
 0x657   : > { %4200 = vrcp.f32 %v1580_v53 }
 0x65a   : > { %v2030_v58 = vpop.permute.xlu0 %2029 }
 0x65e   : > { %v2028_v1 = vpop.permute.xlu0 %2027 }
 0x661   : > { %v4201_v54 = vpop.eup %4200 }
 0x662   : > { %v5108_v55 = vmul.f32 %v4201_v54, %v4199_v51 }
 0x664   : > { %3867 = vmatmul.mubr.msk.f32.vlgmr.msra.gmra.mrb[4].mxu0 %vm1262_vm3, %v5108_v55  ;;  %3872 = vmatmul.mubr.msk.f32.vlgmr.msra.gmra.mrb[8].mxu1 %vm1262_vm3, %v5108_v55 }
 0x665   : > { %3875 = vmatpush3.msra.mxu0 %v3691_v56  ;;  %3876 = vmatprep.mubr.msk.f32.mxu0 %vm4511_vm1, %v4512_v8 }
 0x666   : > { %3881 = vmatprep.mubr.msk.f32.mxu1 %vm4511_vm1, %v4512_v8  ;;  %3884 = vmatprep.subr.mxu0 %v4512_v8 }
 0x667   : > { %3880 = vmatpush3.msra.mxu1 %v3693_v57 }
 0x668   : > { %3889 = vmatprep.subr.mxu1 %v4512_v8 }
 0x737   : > { %v1653_v61 = vpop.f32.mrb[4].mxu0  ;;  %v1727_v62 = vpop.f32.mrb[8].mxu1 }
 0x738   : > { %v3868_v63 = vpop.f32.mrb[5].mxu0  ;;  %v3873_v0 = vpop.f32.mrb[9].mxu1  ;;  %3877 = vmatmul.mubr.msk.f32.vlgmr.msra.gmra.mrb[6].mxu0 %vm1262_vm3, %v1653_v61  ;;  %3882 = vmatmul.mubr.msk.f32.vlgmr.msra.gmra.mrb[10].mxu1 %vm1262_vm3, %v1727_v62 }
 0x739   : > { %3885 = vmatpush3.msra.mxu0 %v1492_v59  ;;  %3890 = vmatpush3.msra.mxu1 %v1493_v60  ;;  %v3709_v59 = vld [vmem:[%s4960_s24 + $0x18] sm:$0xff] }
 0x73a   : > { %3886 = vmatprep.mubr.msk.f32.mxu0 %vm4511_vm1, %v4512_v8  ;;  %3891 = vmatprep.mubr.msk.f32.mxu1 %vm4511_vm1, %v4512_v8 }
 0x73b   : > { %3899 = vmatprep.subr.mxu1 %v4512_v8  ;;  %3894 = vmatprep.subr.mxu0 %v4512_v8 }
 0x73c   : > { %3887 = vmatmul.mubr.msk.f32.vlgmr.msra.gmra.mrb[8].mxu0 %vm1262_vm3, %v1418_v39  ;;  %3892 = vmatmul.mubr.msk.f32.vlgmr.msra.gmra.mrb[12].mxu1 %vm1262_vm3, %v1488_v40 }
 0x73d   : > { %3900 = vmatpush3.msra.mxu1 %v2028_v1  ;;  %3896 = vmatprep.mubr.msk.f32.mxu0 %vm4511_vm1, %v4512_v8 }
 0x73e   : > { %3901 = vmatprep.mubr.msk.f32.mxu1 %vm4511_vm1, %v4512_v8  ;;  %3909 = vmatprep.subr.mxu1 %v4512_v8 }
 0x740   : > { %3895 = vmatpush3.xpose.msk.msra.mxu0 %vm1262_vm3, %v2030_v58 }
 0x741   : > { %3904 = vmatprep.subr.mxu0 %v4512_v8 }
 0x743   : > { %3897 = vmatmul.mubr.msk.f32.vlgmr.msra.gmra.mrb[10].mxu0 %vm1262_vm3, %v2028_v1  ;;  %v3713_v1 = vld [vmem:[%s5571_s29] ss:$0 sm:$0xff]  ;;  %s5583_s29 = sld [smem:[#allocation54_spill]] }
 0x744   : > { %3906 = vmatprep.mubr.msk.f32.mxu0 %vm4511_vm1, %v4512_v8 }
 0x749   : > { %s5584_s28 = scalar_lea.vmem %s5583_s29, %s4940_s30 }
 0x80b   : > { %v1802_v2 = vpop.f32.mrb[6].mxu0  ;;  %v1877_v3 = vpop.f32.mrb[10].mxu1 }
 0x80c   : > { %v3878_v4 = vpop.f32.mrb[7].mxu0  ;;  %v3883_v6 = vpop.f32.mrb[11].mxu1 }
 0x80f   : > { %v1950_v7 = vpop.f32.mrb[8].mxu0  ;;  %v2023_v9 = vpop.f32.mrb[12].mxu1 }
 0x810   : > { %v1951_v10 = vadd.f32 %v1950_v7, %v1802_v2  ;;  %v2024_v11 = vadd.f32 %v2023_v9, %v1877_v3  ;;  %v3888_v13 = vpop.f32.mrb[9].mxu0  ;;  %v3893_v14 = vpop.f32.mrb[13].mxu1  ;;  %v3714_v3 = vld [vmem:[%s5573_s6] ss:$0 sm:$0xff] }
 0x816   : > { %v2101_v15 = vpop.f32.mrb[10].mxu0 }
 0x817   : > { %v2102_v16 = vadd.f32 %v2101_v15, %v5072_v22  ;;  %v3898_v20 = vpop.f32.mrb[11].mxu0 }
 0x819   : > { %v2105_v21 = vsel %vm1262_vm3, %v2102_v16, -inf }
 0x81a   : > { %2106 = vmax.xlane.f32.xlu0 %v2105_v21 }
 0x830   : > { %2417 = vrot.lane.b32.xlu0 %v5057_v18, %s4518_s14 }
 0x834   : > { %2190 = vrot.lane.b32.xlu0 %v5079_v32, %s4517_s21 }
 0x8a7   : > { %v2107_v23 = vpop.xlane.xlu0 %2106 }
 0x8a8   : > { %v2108_v24 = vsub.f32 %v2102_v16, %v2107_v23 }
 0x8aa   : > { %v2109_v25 = vmul.f32 1.442695, %v2108_v24 }
 0x8ab   : > { %v2418_v26 = vpop.permute.xlu0 %2417 }
 0x8ac   : > { %4202 = vpow2.f32 %v2109_v25 }
 0x8af   : > { %v2191_v27 = vpop.permute.xlu0 %2190 }
 0x8b0   : > { %3905 = vmatpush3.msra.mxu0 %v2191_v27 }
 0x8b1   : > { %3914 = vmatprep.subr.mxu0 %v4512_v8 }
 0x8b6   : > { %v4203_v28 = vpop.eup %4202 }
 0x8b7   : > { %v2111_v29 = vsel %vm1262_vm3, %v4203_v28, 0.0 }
 0x8b8   : > { %2112 = vadd.xlane.f32.xlu1 %v2111_v29  ;;  %v2852_v29 = vld [vmem:[%s4974_s12] sm:$0xff] }
 0x8c9   : > { %2415 = vrot.lane.b32.xlu1 %v5060_v19, %s4519_s0 }
 0x945   : > { %v2113_v18 = vpop.xlane.xlu1 %2112 }
 0x946   : > { %4204 = vrcp.f32 %v2113_v18  ;;  %v2853_v18 = vld [vmem:[%s4974_s12 + $0x8] sm:$0xff] }
 0x949   : > { %v2416_v19 = vpop.permute.xlu1 %2415 }
 0x950   : > { %v4205_v30 = vpop.eup %4204 }
 0x951   : > { %v5153_v31 = vmul.f32 %v4205_v30, %v4203_v28  ;;  %v4017_v30 = vpack.c.bf16 %v2853_v18, %v2852_v29 }
 0x953   : > { %3902 = vmatmul.mubr.msk.f32.vlgmr.msra.gmra.mrb[14].mxu1 %vm1262_vm3, %v5153_v31  ;;  %3907 = vmatmul.mubr.msk.f32.vlgmr.msra.gmra.mrb[12].mxu0 %vm1262_vm3, %v5153_v31 }
 0x954   : > { %3910 = vmatpush3.msra.mxu1 %v3701_v33  ;;  %3915 = vmatpush3.msra.mxu0 %v3703_v34  ;;  %v2854_v33 = vld [vmem:[%s4974_s12 + $0x10] sm:$0xff]  ;;  %v2855_v34 = vld [vmem:[%s4974_s12 + $0x18] sm:$0xff] }
 0x955   : > { %3911 = vmatprep.mubr.msk.f32.mxu1 %vm4511_vm1, %v4512_v8  ;;  %3916 = vmatprep.mubr.msk.f32.mxu0 %vm4511_vm1, %v4512_v8 }
 0x956   : > { %3919 = vmatprep.subr.mxu1 %v4512_v8  ;;  %3924 = vmatprep.subr.mxu0 %v4512_v8 }
 0xa26   : > { %v2186_v35 = vpop.f32.mrb[14].mxu1  ;;  %v2259_v36 = vpop.f32.mrb[12].mxu0 }
 0xa27   : > { %v3903_v38 = vpop.f32.mrb[15].mxu1  ;;  %v3908_v39 = vpop.f32.mrb[13].mxu0  ;;  %3912 = vmatmul.mubr.msk.f32.vlgmr.msra.gmra.mrb[16].mxu1 %vm1262_vm3, %v2186_v35  ;;  %3917 = vmatmul.mubr.msk.f32.vlgmr.msra.gmra.mrb[14].mxu0 %vm1262_vm3, %v2259_v36  ;;  %v2937_v35 = vld [vmem:[%s5574_s17] sm:$0xff]  ;;  %v2938_v36 = vld [vmem:[%s5574_s17 + $0x8] sm:$0xff] }
 0xa28   : > { %3920 = vmatpush3.xpose.msk.msra.mxu1 %vm1262_vm3, %v2418_v26  ;;  %3925 = vmatpush3.msra.mxu0 %v2416_v19  ;;  %v2939_v38 = vld [vmem:[%s5574_s17 + $0x10] sm:$0xff]  ;;  %v4023_v39 = vpack.c.bf16 %v2938_v36, %v2937_v35 }
 0xa29   : > { %3921 = vmatprep.mubr.msk.f32.mxu1 %vm4511_vm1, %v4512_v8  ;;  %3929 = vmatprep.subr.mxu1 %v4512_v8 }
 0xa2a   : > { %3926 = vmatprep.mubr.msk.f32.mxu0 %vm4511_vm1, %v4512_v8  ;;  %3934 = vmatprep.subr.mxu0 %v4512_v8 }
 0xa2b   : > { %3922 = vmatmul.mubr.msk.f32.vlgmr.msra.gmra.mrb[18].mxu1 %vm1262_vm3, %v2416_v19  ;;  %v4020_v19 = vpack.c.bf16 %v2855_v34, %v2854_v33 }
 0xa2c   : > { %3931 = vmatprep.mubr.msk.f32.mxu1 %vm4511_vm1, %v4512_v8 }
 0xafa   : > { %v2334_v40 = vpop.f32.mrb[16].mxu1  ;;  %v2409_v41 = vpop.f32.mrb[14].mxu0 }
 0xafb   : > { %v2413_v42 = vadd.f32 %v2334_v40, %v1951_v10  ;;  %v2414_v43 = vadd.f32 %v2409_v41, %v2024_v11  ;;  %v3913_v44 = vpop.f32.mrb[17].mxu1  ;;  %v3918_v45 = vpop.f32.mrb[15].mxu0  ;;  %v2940_v40 = vld [vmem:[%s5574_s17 + $0x18] sm:$0xff] }
 0xafc   : > { %v4026_v41 = vpack.c.bf16 %v2940_v40, %v2939_v38  ;;  %v3725_v38 = vld [vmem:[%s1078_s19] ss:$0 sm:$0xff] }
 0xafe   : > { %v2489_v46 = vpop.f32.mrb[18].mxu1 }
 0xaff   : > { %v2490_v47 = vadd.f32 %v2489_v46, %v5072_v22  ;;  %v3923_v48 = vpop.f32.mrb[19].mxu1 }
 0xb01   : > { %v2493_v49 = vsel %vm1262_vm3, %v2490_v47, -inf }
 0xb02   : > { %2494 = vmax.xlane.f32.xlu0 %v2493_v49 }
 0xb18   : > { %2578 = vrot.lane.b32.xlu0 %v5079_v32, %s4519_s0  ;;  %v3711_v32 = vld [vmem:[%s4965_s7 + $0x18] sm:$0xff]  ;;  %s5581_s0 = sld [smem:[#allocation56_spill]] }
 0xb1e   : > { %s5582_s24 = scalar_lea.vmem %s5581_s0, %s4940_s30 }
 0xb8f   : > { %v2495_v50 = vpop.xlane.xlu0 %2494 }
 0xb90   : > { %v2496_v51 = vsub.f32 %v2490_v47, %v2495_v50 }
 0xb92   : > { %v2497_v52 = vmul.f32 1.442695, %v2496_v51 }
 0xb93   : > { %v2579_v53 = vpop.permute.xlu0 %2578 }
 0xb94   : > { %4206 = vpow2.f32 %v2497_v52  ;;  %3930 = vmatpush3.msra.mxu1 %v2579_v53  ;;  %v3715_v52 = vld [vmem:[%s1081_s26] ss:$0 sm:$0xff] }
 0xb95   : > { %3939 = vmatprep.subr.mxu1 %v4512_v8 }
 0xb9e   : > { %v4207_v54 = vpop.eup %4206 }
 0xb9f   : > { %v2499_v22 = vsel %vm1262_vm3, %v4207_v54, 0.0 }
 0xba0   : > { %2500 = vadd.xlane.f32.xlu1 %v2499_v22  ;;  %v3071_v22 = vld [vmem:[%s5575_s5 + $0x8] sm:$0xff] }
 0xc2d   : > { %v2501_v56 = vpop.xlane.xlu1 %2500 }
 0xc2e   : > { %4208 = vrcp.f32 %v2501_v56  ;;  %v3716_v56 = vld [vmem:[%s1084_s3] ss:$0 sm:$0xff] }
 0xc38   : > { %v4209_v57 = vpop.eup %4208 }
 0xc39   : > { %v5185_v58 = vmul.f32 %v4209_v57, %v4207_v54  ;;  %v3070_v54 = vld [vmem:[%s5575_s5] sm:$0xff] }
 0xc3b   : > { %3927 = vmatmul.mubr.msk.f32.vlgmr.msra.gmra.mrb[16].mxu0 %vm1262_vm3, %v5185_v58  ;;  %3932 = vmatmul.mubr.msk.f32.vlgmr.msra.gmra.mrb[20].mxu1 %vm1262_vm3, %v5185_v58 }
 0xc3c   : > { %3935 = vmatpush3.msra.mxu0 %v3709_v59  ;;  %3936 = vmatprep.mubr.msk.f32.mxu0 %vm4511_vm1, %v4512_v8 }
 0xc3d   : > { %3941 = vmatprep.mubr.msk.f32.mxu1 %vm4511_vm1, %v4512_v8  ;;  %4016 = vmatprep.subr.bf16.mxu0 %v4510_v5 }
 0xc3e   : > { %3940 = vmatpush3.msra.mxu1 %v3711_v32  ;;  %v4035_v32 = vpack.c.bf16 %v3071_v22, %v3070_v54 }
 0xc3f   : > { %4022 = vmatprep.subr.bf16.mxu1 %v4510_v5 }
 0xd0e   : > { %v2574_v60 = vpop.f32.mrb[16].mxu0  ;;  %v2647_v61 = vpop.f32.mrb[20].mxu1 }
 0xd0f   : > { %v3928_v62 = vpop.f32.mrb[17].mxu0  ;;  %v3933_v63 = vpop.f32.mrb[21].mxu1  ;;  %3937 = vmatmul.mubr.msk.f32.vlgmr.msra.gmra.mrb[18].mxu0 %vm1262_vm3, %v2574_v60  ;;  %3942 = vmatmul.mubr.msk.f32.vlgmr.msra.gmra.mrb[22].mxu1 %vm1262_vm3, %v2647_v61 }
 0xd10   : > { %3952 = vmatprep.mubr.msk.f32.mxu0 %vm4511_vm1, %v4512_v8  ;;  %3971 = vmatprep.mubr.msk.f32.mxu1 %vm4511_vm1, %v4512_v8  ;;  %v3072_v62 = vld [vmem:[%s5575_s5 + $0x10] sm:$0xff]  ;;  %v3073_v63 = vld [vmem:[%s5575_s5 + $0x18] sm:$0xff] }
 0xd11   : > { %4018 = vmatpush3.bf16.msra.mxu0 %v4017_v30  ;;  %4024 = vmatpush3.bf16.msra.mxu1 %v4023_v39  ;;  %v3719_v30 = vld [vmem:[%s5584_s28] ss:$0 sm:$0xff] }
 0xd12   : > { %4019 = vmatprep.subr.bf16.mxu0 %v4510_v5  ;;  %4025 = vmatprep.subr.bf16.mxu1 %v4510_v5 }
 0xd15   : > { %4021 = vmatpush3.bf16.msra.mxu0 %v4020_v19  ;;  %4027 = vmatpush3.bf16.msra.mxu1 %v4026_v41 }
 0xd16   : > { %4034 = vmatprep.subr.bf16.mxu0 %v4510_v5  ;;  %4028 = vmatprep.subr.bf16.mxu1 %v4510_v5 }
 0xde2   : > { %v2722_v0 = vpop.f32.mrb[18].mxu0  ;;  %v2797_v2 = vpop.f32.mrb[22].mxu1 }
 0xde3   : > { %v2801_v4 = vadd.f32 %v2722_v0, %v2413_v42  ;;  %v2802_v6 = vadd.f32 %v2797_v2, %v2414_v43  ;;  %v3938_v7 = vpop.f32.mrb[19].mxu0  ;;  %v3943_v9 = vpop.f32.mrb[23].mxu1  ;;  %v2941_v42 = vld [vmem:[%s5574_s17 + $0x20] sm:$0xff]  ;;  %v2942_v43 = vld [vmem:[%s5574_s17 + $0x28] sm:$0xff]  ;;  %v4038_v0 = vpack.c.bf16 %v3073_v63, %v3072_v62 }
 0xde4   : > { %v4029_v44 = vpack.c.bf16 %v2942_v43, %v2941_v42  ;;  %v3155_v2 = vld [vmem:[%s5577_s4] sm:$0xff]  ;;  %v3157_v7 = vld [vmem:[%s5577_s4 + $0x10] sm:$0xff]  ;;  %v3158_v9 = vld [vmem:[%s5577_s4 + $0x18] sm:$0xff] }
 0xde5   : > { %v2810_v10 = vadd.f32 %v3713_v1, %v2801_v4  ;;  %v2818_v11 = vadd.f32 %v3714_v3, %v2802_v6  ;;  %v3156_v3 = vld [vmem:[%s5577_s4 + $0x8] sm:$0xff]  ;;  %v3722_v63 = vld [vmem:[%s1090_s1] ss:$0 sm:$0xff] }
 0xde6   : > { %4030 = vmatpush3.bf16.msra.mxu1 %v4029_v44  ;;  %v4041_v4 = vpack.c.bf16 %v3156_v3, %v3155_v2 }
 0xde7   : > { %v2823_v13 = vadd.f32 %v2810_v10, %v5040_v12  ;;  %v3054_v15 = vadd.f32 %v2818_v11, %v5051_v17  ;;  %4031 = vmatprep.subr.bf16.mxu1 %v4510_v5  ;;  %v4044_v10 = vpack.c.bf16 %v3158_v9, %v3157_v7  ;;  %v2943_v11 = vld [vmem:[%s5574_s17 + $0x30] sm:$0xff] }
 0xde9   : > { %v2824_v14 = vsel %vm1107_vm2, %v2823_v13, 0.0  ;;  %v3055_v16 = vsel %vm1107_vm2, %v3054_v15, 0.0 }
 0xdea   : > { %2825 = vadd.xlane.f32.xlu1 %v2824_v14 }
 0xdee   : > { %3056 = vadd.xlane.f32.xlu1 %v3055_v16  ;;  %v3160_v16 = vld [vmem:[%s5577_s4 + $0x28] sm:$0xff] }
 0xe77   : > { %v2826_v20 = vpop.xlane.xlu1 %2825 }
 0xe78   : > { %v2828_v21 = vmul.f32 0.03125, %v2826_v20 }
 0xe7a   : > { %v2829_v23 = vsub.f32 %v2823_v13, %v2828_v21  ;;  %v2944_v13 = vld [vmem:[%s5574_s17 + $0x38] sm:$0xff] }
 0xe7b   : > { %v3057_v24 = vpop.xlane.xlu1 %3056  ;;  %v4032_v14 = vpack.c.bf16 %v2944_v13, %v2943_v11  ;;  %v3162_v21 = vld [vmem:[%s5577_s4 + $0x38] sm:$0xff] }
 0xe7c   : > { %v3058_v25 = vmul.f32 0.03125, %v3057_v24  ;;  %v2830_v26 = vmul.f32 %v2829_v23, %v2829_v23  ;;  %v3717_v24 = vld [vmem:[%s5580_s22] ss:$0 sm:$0xff] }
 0xe7d   : > { %4033 = vmatpush3.bf16.msra.mxu1 %v4032_v14 }
 0xe7e   : > { %v3059_v27 = vsub.f32 %v3054_v15, %v3058_v25  ;;  %v2831_v12 = vsel %vm1107_vm2, %v2830_v26, 0.0  ;;  %v3159_v15 = vld [vmem:[%s5577_s4 + $0x20] sm:$0xff] }
 0xe7f   : > { %2832 = vadd.xlane.f32.xlu0 %v2831_v12  ;;  %v4047_v20 = vpack.c.bf16 %v3160_v16, %v3159_v15 }
 0xe80   : > { %v3060_v17 = vmul.f32 %v3059_v27, %v3059_v27 }
 0xe82   : > { %v3061_v28 = vsel %vm1107_vm2, %v3060_v17, 0.0 }
 0xe83   : > { %3062 = vadd.xlane.f32.xlu1 %v3061_v28 }
 0xf0c   : > { %v2833_v45 = vpop.xlane.xlu0 %2832 }
 0xf0d   : > { %v2834_v46 = vmul.f32 0.03125, %v2833_v45 }
 0xf0f   : > { %v2835_v47 = vadd.f32 1e-06, %v2834_v46 }
 0xf10   : > { %v3063_v48 = vpop.xlane.xlu1 %3062 }
 0xf11   : > { %4210 = vrsqrt.f32 %v2835_v47  ;;  %v3064_v49 = vmul.f32 0.03125, %v3063_v48 }
 0xf13   : > { %v3065_v50 = vadd.f32 1e-06, %v3064_v49 }
 0xf15   : > { %4212 = vrsqrt.f32 %v3065_v50 }
 0xf1b   : > { %v4211_v51 = vpop.eup %4210 }
 0xf1c   : > { %v2837_v53 = vmul.f32 %v4211_v51, %v2829_v23 }
 0xf1e   : > { %v2844_v57 = vmul.f32 %v3715_v52, %v2837_v53 }
 0xf1f   : > { %v4213_v59 = vpop.eup %4212 }
 0xf20   : > { %v3067_v60 = vmul.f32 %v4213_v59, %v3059_v27  ;;  %v2851_v61 = vadd.f32 %v3716_v56, %v2844_v57 }
 0xf22   : > { %3953 = vmatmul.mubr.msk.f32.vlgmr.msra.gmra.mrb[20].mxu0 %vm1107_vm2, %v2851_v61  ;;  %v3068_v1 = vmul.f32 %v3715_v52, %v3067_v60 }
 0xf23   : > { %4036 = vmatpush3.bf16.msra.mxu0 %v4035_v32  ;;  %3982 = vmatprep.mubr.msk.f32.mxu0 %vm4511_vm1, %v4512_v8 }
 0xf24   : > { %4037 = vmatprep.subr.bf16.mxu0 %v4510_v5  ;;  %v3069_v6 = vadd.f32 %v3716_v56, %v3068_v1 }
 0xf27   : > { %4039 = vmatpush3.bf16.msra.mxu0 %v4038_v0 }
 0xf28   : > { %4040 = vmatprep.subr.bf16.mxu0 %v4510_v5 }
 0xf2a   : > { %3983 = vmatmul.mubr.msk.f32.vlgmr.msra.gmra.mrb[22].mxu0 %vm1107_vm2, %v3069_v6 }
 0xf2b   : > { %4042 = vmatpush3.bf16.msra.mxu0 %v4041_v4  ;;  %4001 = vmatprep.mubr.msk.f32.mxu0 %vm4511_vm1, %v4512_v8  ;;  %v3161_v8 = vld [vmem:[%s5577_s4 + $0x30] sm:$0xff]  ;;  %s5588_s4 = sld [smem:[#allocation26_spill]] }
 0xf2c   : > { %4043 = vmatprep.subr.bf16.mxu0 %v4510_v5  ;;  %v4050_v23 = vpack.c.bf16 %v3162_v21, %v3161_v8 }
 0xf2f   : > { %4045 = vmatpush3.bf16.msra.mxu0 %v4044_v10 }
 0xf30   : > { %4046 = vmatprep.subr.bf16.mxu0 %v4510_v5 }
 0xf31   : > { %p3727_p12 = scmp.ne.s32.totalorder %s5588_s4, 1 }
 0xf32   : > { %3266 = vst.msk [vmem:[%s5020_s15] sm:$0xff] (!%p3727_p12), %vm1262_vm3, %v5083_v37  ;;  %3267 = vst.msk [vmem:[%s5020_s15 + $0x8] sm:$0xff] (!%p3727_p12), %vm1262_vm3, %v5108_v55 }
 0xf33   : > { %4048 = vmatpush3.bf16.msra.mxu0 %v4047_v20  ;;  %3268 = vst.msk [vmem:[%s5020_s15 + $0x10] sm:$0xff] (!%p3727_p12), %vm1262_vm3, %v5153_v31  ;;  %3269 = vst.msk [vmem:[%s5020_s15 + $0x18] sm:$0xff] (!%p3727_p12), %vm1262_vm3, %v5185_v58 }
 0xf34   : > { %4049 = vmatprep.subr.bf16.mxu0 %v4510_v5  ;;  %v3723_v5 = vld [vmem:[%s5582_s24] ss:$0 sm:$0xff] }
 0xf37   : > { %4051 = vmatpush3.bf16.msra.mxu0 %v4050_v23 }
 0xff5   : > { %v2932_v25 = vpop.f32.mrb[20].mxu0 }
 0xff6   : > { %v2933_v26 = vadd.f32 %v3717_v24, %v2932_v25  ;;  %v3954_v27 = vpop.f32.mrb[21].mxu0 }
 0xff8   : > { %v2936_v12 = vmax.f32 %v2933_v26, 0.0 }
 0xffa   : > { %3972 = vmatmul.mubr.msk.f32.vlgmr.msra.gmra.mrb[24].mxu1 %vm2952_vm4, %v2936_v12 }
 0xffd   : > { %v3150_v17 = vpop.f32.mrb[22].mxu0 }
 0xffe   : > { %v3151_v28 = vadd.f32 %v3723_v5, %v3150_v17  ;;  %v3984_v29 = vpop.f32.mrb[23].mxu0 }
0x1000   : > { %v3154_v18 = vmax.f32 %v3151_v28, 0.0 }
0x1002   : > { %4002 = vmatmul.mubr.msk.f32.vlgmr.msra.gmra.mrb[24].mxu0 %vm2952_vm4, %v3154_v18 }
0x10cd   : > { %v3022_v33 = vpop.f32.mrb[24].mxu1 }
0x10ce   : > { %v3023_v34 = vadd.f32 %v3719_v30, %v3022_v33  ;;  %v3973_v19 = vpop.f32.mrb[25].mxu1 }
0x10d0   : > { %v3026_v35 = vadd.f32 %v3023_v34, %v2851_v61  ;;  %v3721_v61 = vld [vmem:[%s1087_s8] ss:$0 sm:$0xff] }
0x10d2   : > { %v3027_v36 = vsel %vm1107_vm2, %v3026_v35, 0.0 }
0x10d3   : > { %3028 = vadd.xlane.f32.xlu1 %v3027_v36 }
0x10d5   : > { %v3239_v39 = vpop.f32.mrb[24].mxu0 }
0x10d6   : > { %v3240_v40 = vadd.f32 %v3725_v38, %v3239_v39  ;;  %v4003_v41 = vpop.f32.mrb[25].mxu0 }
0x10d8   : > { %v3243_v42 = vadd.f32 %v3240_v40, %v3069_v6 }
0x10da   : > { %v3244_v43 = vsel %vm1107_vm2, %v3243_v42, 0.0 }
0x10db   : > { %3245 = vadd.xlane.f32.xlu1 %v3244_v43 }
0x1160   : > { %v3029_v44 = vpop.xlane.xlu1 %3028 }
0x1161   : > { %v3030_v45 = vmul.f32 0.03125, %v3029_v44 }
0x1163   : > { %v3031_v46 = vsub.f32 %v3026_v35, %v3030_v45 }
0x1165   : > { %v3032_v47 = vmul.f32 %v3031_v46, %v3031_v46 }
0x1167   : > { %v3033_v48 = vsel %vm1107_vm2, %v3032_v47, 0.0 }
0x1168   : > { %v3246_v49 = vpop.xlane.xlu1 %3245  ;;  %3034 = vadd.xlane.f32.xlu1 %v3033_v48 }
0x1169   : > { %v3247_v50 = vmul.f32 0.03125, %v3246_v49 }
0x116b   : > { %v3248_v51 = vsub.f32 %v3243_v42, %v3247_v50 }
0x116d   : > { %v3249_v52 = vmul.f32 %v3248_v51, %v3248_v51 }
0x116f   : > { %v3250_v53 = vsel %vm1107_vm2, %v3249_v52, 0.0 }
0x1170   : > { %3251 = vadd.xlane.f32.xlu1 %v3250_v53 }
0x11f5   : > { %v3035_v54 = vpop.xlane.xlu1 %3034 }
0x11f6   : > { %v3036_v22 = vmul.f32 0.03125, %v3035_v54 }
0x11f8   : > { %v3037_v56 = vadd.f32 1e-06, %v3036_v22 }
0x11fa   : > { %4214 = vrsqrt.f32 %v3037_v56 }
0x11fd   : > { %v3252_v57 = vpop.xlane.xlu1 %3251 }
0x11fe   : > { %v3253_v59 = vmul.f32 0.03125, %v3252_v57 }
0x1200   : > { %v3254_v32 = vadd.f32 1e-06, %v3253_v59 }
0x1202   : > { %4216 = vrsqrt.f32 %v3254_v32 }
0x1204   : > { %v4215_v60 = vpop.eup %4214 }
0x1205   : > { %v3039_v62 = vmul.f32 %v4215_v60, %v3031_v46 }
0x1207   : > { %v3046_v0 = vmul.f32 %v3721_v61, %v3039_v62 }
0x1209   : > { %v3053_v1 = vadd.f32 %v3722_v63, %v3046_v0 }
0x120b   : > { %3259 = vst.msk [vmem:[#allocation2] sm:$0xff] %vm1107_vm2, %v3053_v1 }
0x120c   : > { %v4217_v2 = vpop.eup %4216 }
0x120d   : > { %v3256_v3 = vmul.f32 %v4217_v2, %v3248_v51  ;;  %3264 = sbr.rel (%p3727_p12) target bundleno = 4628 (0x1214), region = 128 }
0x120f   : > { %v3257_v4 = vmul.f32 %v3721_v61, %v3256_v3 }
0x1211   : > { %v3258_v6 = vadd.f32 %v3722_v63, %v3257_v4 }
0x1213   : > { %3260 = vst.msk [vmem:[#allocation3] sm:$0xff] %vm1107_vm2, %v3258_v6  ;;  %3265 = vst.msk [vmem:[%s1018_s11] sm:$0xff] (!%p3727_p12), %vm1107_vm2, %v3258_v6 }
0x1214 PF: > { %s5589_s30 = sld [smem:[#allocation27_spill]]  ;;  %s5590_s8 = sld [smem:[#allocation38_spill]] }
0x1215   : > { %s5591_s1 = sld [smem:[#allocation33_spill]]  ;;  %s5592_s26 = sld [smem:[#allocation63_spill]] }
0x1216   : > { %s3289_s20 = sshll.u32 %s1018_s11, 4  ;;  %s4520_s14 = smov [#allocation12]   ;;  %s3290_s20 = int_to_ptr.vmem [resolvable:$true] %s3289_s20 }
0x1217   : > { %s4336_s21 = scalar_lea.vmem %s3290_s20, 128  ;;  %s4340_s0 = sshll.u32 %s4520_s14, 4  ;;  %s4341_s0 = int_to_ptr.vmem [resolvable:$false] %s4340_s0 }
0x1218   : > { %p4337_p4 = scmp.ne.s32.totalorder %s3290_s20, %s4336_s21  ;;  %s4342_s24 = scalar_lea.vmem %s4341_s0, 256 }
0x1219   : > { %p4343_p8 = scmp.lt.s32.totalorder %s3290_s20, %s4341_s0  ;;  %p4344_p10 = scmp.lt.s32.totalorder %s4342_s24, %s4336_s21 }
0x121a   : > { %s3730_s23 = sshll.u32 %s5589_s30, 7  ;;  %s3271_s22 = scalar_lea.sflag [#allocation6], %s5590_s8 }
0x121b   : > { %s5327_s3 = scalar_lea.hbm %s5592_s26, %s3730_s23  ;;  %p5593_p2 = scmp.ne.s32.totalorder %s5591_s1, 0 }
0x121c   : > { %p4345_p11 = por %p4344_p10, %p4343_p8 }
0x121d   : > { %p4338_p1 = pnand %p4337_p4, %p5593_p2 }
0x121f   : > { %p4339_p9 = pneg %p4338_p1 }
0x1221   : > { %p4346_p3 = pnand %p4345_p11, %p4339_p9 }
0x1223   : > { %4349 = shalt.err (!%p4346_p3)
}
0x1224   : > { %s4350_s10 = scalar_lea.hbm %s5327_s3, 128  ;;  %s4354_s16 = scalar_lea.hbm %s5592_s26, 256 }
0x1225   : > { %p4351_p6 = scmp.ne.s32.totalorder %s5327_s3, %s4350_s10  ;;  %p4355_p13 = scmp.lt.u32.totalorder %s5327_s3, %s5592_s26 }
0x1226   : > { %p4356_p5 = scmp.lt.u32.totalorder %s4354_s16, %s4350_s10  ;;  %p4358_p4 = scmp.lt.u32.totalorder %s4350_s10, %s5327_s3 }
0x1227   : > { %p4352_p7 = pnand %p4351_p6, %p5593_p2 }
0x1228   : > { %p4357_p12 = por %p4356_p5, %p4355_p13 }
0x1229   : > { %p4353_p0 = pneg %p4352_p7 }
0x122a   : > { %p4359_p1 = por %p4358_p4, %p4357_p12 }
0x122c   : > { %p4360_p9 = pnand %p4359_p1, %p4353_p0 }
0x122e   : > { %4363 = shalt.err (!%p4360_p9)
}
0x122f   : > { %4062 = dma.vmem_to_hbm [thread:$0]  (%p5593_p2), %s3290_s20, 128, %s5327_s3, %s3271_s22  }
0x1230   : > { %s3743_s18 = sshll.u32 %s5589_s30, 9  ;;  %s3302_s9 = sshll.u32 %s5020_s15, 4  ;;  %s5356_s9 = int_to_ptr.vmem [resolvable:$true] %s3302_s9 }
0x1231   : > { %s5594_s17 = sld [smem:[#allocation64_spill]]  ;;  %s3276_s12 = scalar_lea.sflag [#allocation14], %s5590_s8 }
0x1232   : > { %s4364_s25 = scalar_lea.vmem %s5356_s9, 512  ;;  %s4521_s27 = smov [#allocation13]  }
0x1233   : > { %p4365_p8 = scmp.ne.s32.totalorder %s5356_s9, %s4364_s25  ;;  %s4368_s4 = sshll.u32 %s4521_s27, 4  ;;  %s4369_s4 = int_to_ptr.vmem [resolvable:$false] %s4368_s4 }
0x1234   : > { %s4370_s15 = scalar_lea.vmem %s4369_s4, 1024  ;;  %p4371_p3 = scmp.lt.s32.totalorder %s5356_s9, %s4369_s4 }
0x1235   : > { %p4366_p10 = pnand %p4365_p8, %p5593_p2  ;;  %p4372_p6 = scmp.lt.s32.totalorder %s4370_s15, %s4364_s25 }
0x1237   : > { %s5354_s5 = scalar_lea.hbm %s5594_s17, %s3743_s18  ;;  %p4367_p11 = pneg %p4366_p10 }
0x1238   : > { %p4373_p7 = por %p4372_p6, %p4371_p3 }
0x123a   : > { %p4374_p0 = pnand %p4373_p7, %p4367_p11 }
0x123c   : > { %4377 = shalt.err (!%p4374_p0)
}
0x123d   : > { %s4378_s30 = scalar_lea.hbm %s5354_s5, 512  ;;  %s4382_s2 = scalar_lea.hbm %s5594_s17, 1024 }
0x123e   : > { %p4379_p13 = scmp.ne.s32.totalorder %s5354_s5, %s4378_s30  ;;  %p4383_p4 = scmp.lt.u32.totalorder %s5354_s5, %s5594_s17 }
0x123f   : > { %p4384_p1 = scmp.lt.u32.totalorder %s4382_s2, %s4378_s30  ;;  %p4386_p8 = scmp.lt.u32.totalorder %s4378_s30, %s5354_s5 }
0x1240   : > { %p4380_p5 = pnand %p4379_p13, %p5593_p2 }
0x1241   : > { %p4385_p9 = por %p4384_p1, %p4383_p4 }
0x1242   : > { %p4381_p12 = pneg %p4380_p5 }
0x1243   : > { %p4387_p10 = por %p4386_p8, %p4385_p9 }
0x1245   : > { %p4388_p11 = pnand %p4387_p10, %p4381_p12 }
0x1247   : > { %4391 = shalt.err (!%p4388_p11)
}
0x1248   : > { %s4522_s22 = smov 128   ;;  %s4523_s21 = smov 8  }
0x1249   : > { %4063 = dma.vmem_to_hbm [thread:$0]  (%p5593_p2), %s5356_s9, 512, %s5354_s5, %s3276_s12, %s4522_s22, %s4522_s22, %s4523_s21  }
0x124a PF: > { %s5595_s14 = sld [smem:[#allocation30_spill]]  ;;  %s5596_s0 = sld [smem:[#allocation23_spill]] }
0x124b   : > { %s5597_s24 = sld [smem:[#allocation32_spill]] }
0x1250   : > { %p4090_p3 = scmp.ge.s32.totalorder %s5595_s14, 2  ;;  %s3317_s10 = sand.u32 1, %s5596_s0  }
0x1251   : > { %p5598_p6 = scmp.ne.s32.totalorder %s5597_s24, 0  ;;  %s3318_s11 = scalar_lea.sflag [#allocation6], %s3317_s10 }
0x1253   : > { %p4081_p7 = pnand %p4090_p3, %p5598_p6 }
0x1255   : > { %4453 = dma.done.wait (!%p4081_p7), %s3318_s11, 128  }
0x1256   : > { %4455 = vsyncadd (!%p4081_p7), %s3318_s11, 4294967168  ;;  %s3327_s7 = scalar_lea.sflag [#allocation14], %s3317_s10 }
0x1257   : > { %4457 = dma.done.wait (!%p4081_p7), %s3327_s7, 512  }
0x1258   : > { %4459 = vsyncadd (!%p4081_p7), %s3327_s7, 4294966784  ;;  %s48_s6 = sadd.s32 1, %s5595_s14   ;;  %s5599_s3 = sld [smem:[#allocation21_spill]] }
0x1259   : > { %p45_p0 = scmp.ge.s32.totalorder %s48_s6, 6   ;;  %s5600_s28 = sld [smem:[#allocation22_spill]] }
0x125a   : > { %s5601_s29 = sld [smem:[#allocation36_spill]]  ;;  %s5602_s30 = sld [smem:[#allocation24_spill]] }
0x125b   : > { %s5603_s4 = sld [smem:[#allocation25_spill]]  ;;  %s5604_s0 = sld [smem:[#allocation37_spill]] }
0x125c   : > { %s5605_s23 = sld [smem:[#allocation28_spill]]  ;;  %s5606_s1 = sld [smem:[#allocation29_spill]] }
0x125d   : > { %s5607_s5 = sld [smem:[#allocation34_spill]]  ;;  %s5608_s24 = sld [smem:[#allocation35_spill]] }
0x125e   :  { %47 = sbr.rel (!%p45_p0) target bundleno = 39 (0x27), region = 261 }
0x1265   :  { %3332 = vsyncpa [#allocation5], 1 }
0x1266   :  { %3334 = vsyncpa [#allocation5 + $0x1], 1 }
0x1267   :  { %3335 = vsyncpa [#allocation8], 1 }
0x1268   :  { %3337 = vsyncpa [#allocation8 + $0x1], 1 }
0x1269   :  { %3338 = vsyncpa [#allocation11], 1 }
0x126a   :  { %3340 = vsyncpa [#allocation11 + $0x1], 1 }
0x126b   :  { %3341 = vsyncpa [#allocation6], 1 }
0x126c   :  { %3343 = vsyncpa [#allocation6 + $0x1], 1 }
0x126d   :  { %3344 = vsyncpa [#allocation14], 1 }
0x126e   :  { %3346 = vsyncpa [#allocation14 + $0x1], 1 }

</bundles_post_ra>
